<compile_context>
chip_gen: v6e
topology: v6e:2x2x1
jax: 0.10.0
libtpu: 0.0.40
codegen_flags: <defaults>
</compile_context>

<pallas_src>
import jax
import jax.numpy as jnp
import numpy as np
from jax.experimental import pallas as pl
from jax.experimental.pallas import tpu as pltpu

_EPS = 1e-5   # PyTorch BatchNorm default eps
_PAD = 8      # xyz coordinate dim padded 3 -> 8 lanes (padded weights are zero)


# ---------------------------------------------------------------------------
# shared helpers
# ---------------------------------------------------------------------------
def _affine_from_stats(s, ss, count, gamma, beta):
    """Fold train-mode BatchNorm (global batch stats, one-pass sum/sumsq)
    into a per-channel scale/shift.
    NOTE: one-pass variance can lose precision for very large counts / means;
    acceptable here, documented as a known limitation."""
    mu = s / count
    var = jnp.maximum(ss / count - mu * mu, 0.0)
    scale = gamma * jax.lax.rsqrt(var + _EPS)
    return scale, beta - mu * scale


def _round_up(x, m):
    return (x + m - 1) // m * m


def _vmem_limit_bytes():
    cap = 64 * 1024 * 1024
    try:
        cap = int(pltpu.get_tpu_info().vmem_capacity_bytes)
    except Exception:
        pass
    return max(32 * 1024 * 1024, min(cap * 3 // 4, 100 * 1024 * 1024))


def _knn_idx(xyz, k):
    # pointops.knnquery equivalent: brute-force k nearest neighbors (self first).
    d2 = jnp.sum((xyz[:, :, None, :] - xyz[:, None, :, :]) ** 2, axis=-1)
    _, idx = jax.lax.top_k(-d2, k)
    return idx  # (b, n, k)


# ---------------------------------------------------------------------------
# main wrapper (kernels are closures over the static tiling configuration)
# ---------------------------------------------------------------------------
def point_transformer_layer(xyz, features, params, share_planes, nsample,
                            max_tile=None, matmul_dtype=jnp.bfloat16,
                            approx_recip=True):
    p = params
    f32 = jnp.float32
    b, n, _ = xyz.shape
    cin = features.shape[-1]
    k = nsample
    assert n >= k  # mirrors torch's `if xyz.size(1) < self.k` guard

    mid = p['wq'].shape[1]
    out_p = p['wv'].shape[1]
    attn_p = p['wg1'].shape[1]
    # The einops.reduce 'b n k (i j) -> b n k j' (sum, j=mid) is the identity
    # only because mid_planes == out_planes in this module; guard it explicitly.
    assert mid == out_p and out_p % attn_p == 0
    share = out_p // attn_p

    # lane-dense packing: pack this many points per 128-lane output row
    pack = 128 // out_p if (out_p < 128 and 128 % out_p == 0) else 1

    # ---- KNN + neighbor gather (data-dependent indexing stays in glue) ------
    knn_idx = _knn_idx(xyz, k)                               # (b, n, k)
    gather_flat = jax.vmap(lambda pts, idx: pts[idx.reshape(-1)])
    knn_xyz = gather_flat(xyz, knn_idx)                      # (b, n*k, 3)
    knn_feat = gather_flat(features, knn_idx)                # (b, n*k, cin)

    bn = b * n
    cnt = jnp.float32(bn * k)

    # ---- hoisted BN(3) stats for fc_delta[1] (tiny 3-channel precompute) -----
    delta3 = (xyz[:, :, None, :] - knn_xyz.reshape(b, n, k, 3)).reshape(bn * k, 3)
    h0 = jnp.dot(delta3, p['wd1'], precision=jax.lax.Precision.HIGHEST)
    sd3, td3 = _affine_from_stats(jnp.sum(h0, axis=0), jnp.sum(h0 * h0, axis=0),
                                  cnt, p['gd'], p['betad'])
    sd = jnp.zeros((1, _PAD), f32).at[0, :3].set(sd3)        # padded lanes stay 0
    td = jnp.zeros((1, _PAD), f32).at[0, :3].set(td3)

    # ---- padded fc_delta weights ---------------------------------------------
    wd1p = jnp.zeros((_PAD, _PAD), f32).at[:3, :3].set(p['wd1'])
    wd2p = jnp.zeros((_PAD, out_p), f32).at[:3, :].set(p['wd2'])

    # bf16 inputs for the q/k/v projection matmuls (f32 MXU accumulation).
    wq_m = p['wq'].astype(matmul_dtype)
    wk_m = p['wk'].astype(matmul_dtype)
    wv_m = p['wv'].astype(matmul_dtype)
    feat_bytes = jnp.dtype(matmul_dtype).itemsize

    # biases exactly cancelled by a following train-mode BN (bq, bk, bd1, bg1,
    # and bd2 on the logits path) are dropped; bv+bd2 folded into one constant.
    bvd = (p['bv'] + p['bd2'])[None, :].astype(f32)
    bg2 = p['bg2'][None, :].astype(f32)
    tilemat = jnp.tile(jnp.eye(attn_p, dtype=f32), (1, share))  # (attn_p, out_p)

    # ---- tile sizing: fill the generation's VMEM budget ----------------------
    vmem_limit = _vmem_limit_bytes()
    const_arrays = [wq_m, wk_m, wv_m, wd1p, sd, td, wd2p, p['wg1'], p['wg2'],
                    bg2, bvd, tilemat,
                    jnp.zeros((1, mid), f32), jnp.zeros((1, mid), f32),
                    jnp.zeros((1, attn_p), f32), jnp.zeros((1, attn_p), f32)]
    const_bytes = 2 * sum(int(np.prod(a.shape)) * a.dtype.itemsize
                          for a in const_arrays)
    in_per_pt = 2 * ((1 + k) * (_PAD * 4 + cin * feat_bytes))   # double-buffered
    out_per_pt = 2 * out_p * 4                                  # double-buffered
    tmp_per_pt = 4 * (k * (2 * mid + 4 * out_p + 2 * attn_p + 2 * _PAD) + 4 * mid)
    per_pt = in_per_pt + out_per_pt + tmp_per_pt
    budget = max(vmem_limit - const_bytes - (4 << 20), per_pt * 8)

    align = max(8 * pack, 16 if feat_bytes < 4 else 8)   # layout-legal tile unit
    target = budget // per_pt
    if max_tile is not None:
        target = min(target, max_tile)
    target = min(target, 2048, _round_up(bn, align))
    tm = max(align, (target // align) * align)

    bn_pad = _round_up(bn, tm)
    nt = bn_pad // tm
    bnk_pad = bn_pad * k
    n_split = 2 if (nt % 2 == 0 and nt >= 2) else 1      # v7x: shard stats on 2 TCs
    nt_per = nt // n_split
    needs_mask = bn_pad != bn

    # ---- pad + flatten the data streams ---------------------------------------
    def pad_rows(x, rows):
        return jnp.pad(x, ((0, rows - x.shape[0]), (0, 0)))

    def pad_lanes(x, to):
        return jnp.pad(x, ((0, 0), (0, to - x.shape[-1])))

    xyz2 = pad_rows(pad_lanes(xyz.reshape(bn, 3), _PAD), bn_pad)
    xyzn2 = pad_rows(pad_lanes(knn_xyz.reshape(bn * k, 3), _PAD), bnk_pad)
    feat2 = pad_rows(features.reshape(bn, cin), bn_pad).astype(matmul_dtype)
    featn2 = pad_rows(knn_feat.reshape(bn * k, cin), bnk_pad).astype(matmul_dtype)
    data_args = (xyz2, xyzn2, feat2, featn2)

    # ---- in-kernel helpers (closures over static ints) ------------------------
    def tile_g(xyz_t, xyzn_t, q, kf, wd1, sdv, tdv, wd2):
        """Per-tile pre-BN attention logits g0 = q_i - k_j + pos0, and pos0."""
        # TODO(synk): if XLU/VPU-bound, restage the (tm,1,C)->(tm,k,C) sublane
        # broadcasts as stride-0 pl.ds reloads from a VMEM scratch.
        delta = (xyz_t.reshape(tm, 1, _PAD)
                 - xyzn_t.reshape(tm, k, _PAD)).reshape(tm * k, _PAD)
        h = jnp.dot(delta, wd1, preferred_element_type=f32)
        h = jnp.maximum(h * sdv + tdv, 0.0)                   # hoisted BN(3) + ReLU
        pos0 = jnp.dot(h, wd2, preferred_element_type=f32)    # (tm*k, out_p)
        g0 = (q.reshape(tm, 1, mid)
              - kf.reshape(tm, k, mid)).reshape(tm * k, mid) + pos0
        return g0, pos0

    def row_mask(tile_idx):
        rows = tile_idx * tm + jax.lax.broadcasted_iota(jnp.int32, (tm, 1), 0)
        return (rows < bn).astype(f32)                        # (tm, 1)

    # ---- stats kernels (one-pass sum / sumsq, padded rows masked) -------------
    def g1_stats_kernel(xyz_ref, xyzn_ref, feat_ref, featn_ref,
                        wq_ref, wk_ref, wd1_ref, sd_ref, td_ref, wd2_ref,
                        sum_ref, sq_ref):
        i = pl.program_id(1)

        @pl.when(i == 0)
        def _init():
            sum_ref[...] = jnp.zeros_like(sum_ref)
            sq_ref[...] = jnp.zeros_like(sq_ref)

        q = jnp.dot(feat_ref[...], wq_ref[...], preferred_element_type=f32)
        kf = jnp.dot(featn_ref[...], wk_ref[...], preferred_element_type=f32)
        g0, _ = tile_g(xyz_ref[...], xyzn_ref[...], q, kf,
                       wd1_ref[...], sd_ref[...], td_ref[...], wd2_ref[...])
        if needs_mask:
            m = row_mask(pl.program_id(0) * nt_per + i)
            g0 = (g0.reshape(tm, k, mid) * m[:, :, None]).reshape(tm * k, mid)
        sum_ref[...] += jnp.sum(g0, axis=0).reshape(1, 1, mid)
        sq_ref[...] += jnp.sum(g0 * g0, axis=0).reshape(1, 1, mid)

    def g2_stats_kernel(xyz_ref, xyzn_ref, feat_ref, featn_ref,
                        wq_ref, wk_ref, wd1_ref, sd_ref, td_ref, wd2_ref,
                        sg1_ref, tg1_ref, wg1_ref,
                        sum_ref, sq_ref):
        i = pl.program_id(1)

        @pl.when(i == 0)
        def _init():
            sum_ref[...] = jnp.zeros_like(sum_ref)
            sq_ref[...] = jnp.zeros_like(sq_ref)

        q = jnp.dot(feat_ref[...], wq_ref[...], preferred_element_type=f32)
        kf = jnp.dot(featn_ref[...], wk_ref[...], preferred_element_type=f32)
        g0, _ = tile_g(xyz_ref[...], xyzn_ref[...], q, kf,
                       wd1_ref[...], sd_ref[...], td_ref[...], wd2_ref[...])
        g1 = jnp.maximum(g0 * sg1_ref[...] + tg1_ref[...], 0.0)
        g2 = jnp.dot(g1, wg1_ref[...], preferred_element_type=f32)
        if needs_mask:
            m = row_mask(pl.program_id(0) * nt_per + i)
            g2 = (g2.reshape(tm, k, attn_p) * m[:, :, None]).reshape(tm * k, attn_p)
        sum_ref[...] += jnp.sum(g2, axis=0).reshape(1, 1, attn_p)
        sq_ref[...] += jnp.sum(g2 * g2, axis=0).reshape(1, 1, attn_p)

    # ---- forward kernel --------------------------------------------------------
    def forward_kernel(xyz_ref, xyzn_ref, feat_ref, featn_ref,
                       wq_ref, wk_ref, wv_ref, wd1_ref, sd_ref, td_ref, wd2_ref,
                       sg1_ref, tg1_ref, wg1_ref, sg2_ref, tg2_ref,
                       wg2_ref, bg2_ref, bvd_ref, tile_ref, out_ref):
        q = jnp.dot(feat_ref[...], wq_ref[...], preferred_element_type=f32)
        # separate k / v matmuls: avoids slicing a fused result at a non-128
        # lane boundary (which would force a lane-relayout copy each step).
        kf = jnp.dot(featn_ref[...], wk_ref[...], preferred_element_type=f32)
        vf = jnp.dot(featn_ref[...], wv_ref[...], preferred_element_type=f32)
        g0, pos0 = tile_g(xyz_ref[...], xyzn_ref[...], q, kf,
                          wd1_ref[...], sd_ref[...], td_ref[...], wd2_ref[...])

        # fc_gamma with hoisted (global, train-mode) BatchNorm scale/shift
        g = jnp.maximum(g0 * sg1_ref[...] + tg1_ref[...], 0.0)
        g = jnp.dot(g, wg1_ref[...], preferred_element_type=f32)
        g = jnp.maximum(g * sg2_ref[...] + tg2_ref[...], 0.0)
        g = jnp.dot(g, wg2_ref[...], preferred_element_type=f32) + bg2_ref[...]

        # softmax over the k neighbors (dim=-2 of (b, n, k, attn_p))
        g3 = g.reshape(tm, k, attn_p)
        mmax = jnp.max(g3, axis=1, keepdims=True)
        e = jnp.exp(g3 - mmax)
        denom = jnp.sum(e, axis=1, keepdims=True)
        if approx_recip:
            attn = e * pl.reciprocal(denom, approx=True)      # EUP, not a VPU divide
        else:
            attn = e / denom

        # broadcast attn (.., attn_p) to the (s a) channel layout with a tiny
        # 0/1 matmul on the otherwise-idle MXU instead of a lane-permute tile.
        attn_full = jnp.dot(attn.reshape(tm * k, attn_p), tile_ref[...],
                            preferred_element_type=f32)        # (tm*k, out_p)
        w = vf + pos0 + bvd_ref[...]                           # v + pos (+ bv + bd2)
        res = jnp.sum((w * attn_full).reshape(tm, k, out_p), axis=1)   # (tm, out_p)
        # lane-dense store: pack `pack` points per 128-lane output row
        out_ref[...] = res.reshape(tm // pack, pack * out_p)

    # ---- BlockSpecs -----------------------------------------------------------
    def data_specs(ngrid):
        if ngrid == 1:
            idx = lambda i: (i, 0)
        else:
            idx = lambda c, i: (c * nt_per + i, 0)
        return [pl.BlockSpec((tm, _PAD), idx),
                pl.BlockSpec((tm * k, _PAD), idx),
                pl.BlockSpec((tm, cin), idx),
                pl.BlockSpec((tm * k, cin), idx)]

    def const_spec(a, ngrid):
        zero = (0,) * a.ndim
        if ngrid == 1:
            return pl.BlockSpec(a.shape, lambda i, z=zero: z)
        return pl.BlockSpec(a.shape, lambda c, i, z=zero: z)

    def stat_out_spec(ch):
        return pl.BlockSpec((1, 8, ch), lambda c, i: (c, 0, 0))

    cp_stats = pltpu.CompilerParams(
        dimension_semantics=("parallel", "arbitrary"),
        vmem_limit_bytes=vmem_limit)
    cp_fwd = pltpu.CompilerParams(
        dimension_semantics=("parallel",),
        vmem_limit_bytes=vmem_limit)

    proj_flops = 2 * (bn_pad + bnk_pad) * cin * mid
    pos_flops = 2 * bnk_pad * (_PAD * _PAD + _PAD * out_p)
    data_bytes = (bn_pad * (_PAD * 4 + cin * feat_bytes)
                  + bnk_pad * (_PAD * 4 + cin * feat_bytes))

    # ---- pass 1: global stats of g0 (input of fc_gamma BN #1) ----------------
    s1_consts = (wq_m, wk_m, wd1p, sd, td, wd2p)
    s1_cost = pl.CostEstimate(flops=int(proj_flops + pos_flops + 4 * bnk_pad * mid),
                              transcendentals=0,
                              bytes_accessed=int(data_bytes + const_bytes))
    g1_sum_p, g1_sq_p = pl.pallas_call(
        g1_stats_kernel,
        out_shape=(jax.ShapeDtypeStruct((n_split, 8, mid), f32),
                   jax.ShapeDtypeStruct((n_split, 8, mid), f32)),
        grid=(n_split, nt_per),
        in_specs=data_specs(2) + [const_spec(a, 2) for a in s1_consts],
        out_specs=(stat_out_spec(mid), stat_out_spec(mid)),
        compiler_params=cp_stats,
        cost_estimate=s1_cost,
    )(*data_args, *s1_consts)
    g1_sum = jnp.sum(g1_sum_p[:, 0, :], axis=0)
    g1_sq = jnp.sum(g1_sq_p[:, 0, :], axis=0)
    sg1v, tg1v = _affine_from_stats(g1_sum, g1_sq, cnt, p['gg1'], p['betag1'])
    sg1, tg1 = sg1v[None, :], tg1v[None, :]

    # ---- pass 2: global stats of relu(BN(g0)) @ Wg1 (fc_gamma BN #2) ---------
    s2_consts = s1_consts + (sg1, tg1, p['wg1'])
    s2_cost = pl.CostEstimate(
        flops=int(proj_flops + pos_flops + 2 * bnk_pad * mid * attn_p
                  + 6 * bnk_pad * mid),
        transcendentals=0,
        bytes_accessed=int(data_bytes + const_bytes))
    g2_sum_p, g2_sq_p = pl.pallas_call(
        g2_stats_kernel,
        out_shape=(jax.ShapeDtypeStruct((n_split, 8, attn_p), f32),
                   jax.ShapeDtypeStruct((n_split, 8, attn_p), f32)),
        grid=(n_split, nt_per),
        in_specs=data_specs(2) + [const_spec(a, 2) for a in s2_consts],
        out_specs=(stat_out_spec(attn_p), stat_out_spec(attn_p)),
        compiler_params=cp_stats,
        cost_estimate=s2_cost,
    )(*data_args, *s2_consts)
    g2_sum = jnp.sum(g2_sum_p[:, 0, :], axis=0)
    g2_sq = jnp.sum(g2_sq_p[:, 0, :], axis=0)
    sg2v, tg2v = _affine_from_stats(g2_sum, g2_sq, cnt, p['gg2'], p['betag2'])
    sg2, tg2 = sg2v[None, :], tg2v[None, :]

    # ---- pass 3: full forward -------------------------------------------------
    f_consts = (wq_m, wk_m, wv_m, wd1p, sd, td, wd2p, sg1, tg1, p['wg1'],
                sg2, tg2, p['wg2'], bg2, bvd, tilemat)
    fwd_flops = (proj_flops + 2 * bnk_pad * cin * out_p + pos_flops
                 + 2 * bnk_pad * (mid * attn_p + attn_p * attn_p + attn_p * out_p)
                 + 16 * bnk_pad * out_p)
    fwd_cost = pl.CostEstimate(
        flops=int(fwd_flops),
        transcendentals=int(bnk_pad * attn_p),
        bytes_accessed=int(data_bytes + bn_pad * out_p * 4 + const_bytes))

    out2 = pl.pallas_call(
        forward_kernel,
        out_shape=jax.ShapeDtypeStruct((bn_pad // pack, pack * out_p), f32),
        grid=(nt,),
        in_specs=data_specs(1) + [const_spec(a, 1) for a in f_consts],
        out_specs=pl.BlockSpec((tm // pack, pack * out_p), lambda i: (i, 0)),
        compiler_params=cp_fwd,
        cost_estimate=fwd_cost,
    )(*data_args, *f_consts)

    out = out2.reshape(bn_pad, out_p)[:bn]     # unpack lane-dense rows, drop padding
    return out.reshape(b, n, out_p)


# ---------------------------------------------------------------------------
# parameters & pure-JAX reference (torch semantics, train-mode BN)
# ---------------------------------------------------------------------------
def init_params(key, in_planes, out_planes, share_planes):
    mid = out_planes
    attn = out_planes // share_planes
    keys = jax.random.split(key, 7)

    def linear(k, fan_in, fan_out):
        k1, k2 = jax.random.split(k)
        bound = 1.0 / np.sqrt(fan_in)
        w = jax.random.uniform(k1, (fan_in, fan_out), jnp.float32, -bound, bound)
        b = jax.random.uniform(k2, (fan_out,), jnp.float32, -bound, bound)
        return w, b

    p = {}
    p['wq'], p['bq'] = linear(keys[0], in_planes, mid)
    p['wk'], p['bk'] = linear(keys[1], in_planes, mid)
    p['wv'], p['bv'] = linear(keys[2], in_planes, out_planes)
    p['wd1'], p['bd1'] = linear(keys[3], 3, 3)
    p['wd2'], p['bd2'] = linear(keys[4], 3, out_planes)
    p['wg1'], p['bg1'] = linear(keys[5], mid, attn)
    p['wg2'], p['bg2'] = linear(keys[6], attn, attn)
    # BatchNorm affine params (PyTorch defaults: weight=1, bias=0)
    p['gd'] = jnp.ones((3,), jnp.float32)
    p['betad'] = jnp.zeros((3,), jnp.float32)
    p['gg1'] = jnp.ones((mid,), jnp.float32)
    p['betag1'] = jnp.zeros((mid,), jnp.float32)
    p['gg2'] = jnp.ones((attn,), jnp.float32)
    p['betag2'] = jnp.zeros((attn,), jnp.float32)
    return p


def reference_forward(xyz, features, p, share_planes, nsample):
    """Pure-JAX reference mirroring the torch forward (train-mode BN)."""
    b, n, _ = xyz.shape
    k = nsample
    knn_idx = _knn_idx(xyz, k)
    gather = jax.vmap(
        lambda pts, idx: pts[idx.reshape(-1)].reshape(idx.shape + (pts.shape[-1],)))
    knn_xyz = gather(xyz, knn_idx)  # (b, n, k, 3)

    hp = jax.lax.Precision.HIGHEST

    def lin(x, w, bias):
        return jnp.einsum('...i,ij->...j', x, w, precision=hp) + bias

    def bn(x, gamma, beta):
        mu = jnp.mean(x, axis=(0, 1, 2), keepdims=True)
        var = jnp.mean((x - mu) ** 2, axis=(0, 1, 2), keepdims=True)
        return (x - mu) / jnp.sqrt(var + _EPS) * gamma + beta

    q = lin(features, p['wq'], p['bq'])
    kf = gather(lin(features, p['wk'], p['bk']), knn_idx)
    vf = gather(lin(features, p['wv'], p['bv']), knn_idx)
    delta = xyz[:, :, None, :] - knn_xyz
    h = lin(delta, p['wd1'], p['bd1'])
    h = jnp.maximum(bn(h, p['gd'], p['betad']), 0.0)
    pos = lin(h, p['wd2'], p['bd2'])
    g = q[:, :, None, :] - kf + pos  # (i j)->j reduce is identity (mid == out)
    g = jnp.maximum(bn(g, p['gg1'], p['betag1']), 0.0)
    g = lin(g, p['wg1'], p['bg1'])
    g = jnp.maximum(bn(g, p['gg2'], p['betag2']), 0.0)
    g = lin(g, p['wg2'], p['bg2'])
    attn = jax.nn.softmax(g, axis=-2)
    a = attn.shape[-1]
    w = (vf + pos).reshape(b, n, k, share_planes, a)
    res = jnp.einsum('bnksa,bnka->bnsa', w, attn, precision=hp)
    return res.reshape(b, n, share_planes * a)


if __name__ == "__main__":
    in_planes, out_planes, share_planes, nsample = 16, 32, 4, 8
    # n=63 is deliberately not tile-aligned so the bn-padding + stats-masking
    # path is exercised; max_tile=32 forces a 4-step grid so the pipelined,
    # accumulator and two-shard stats paths all run.
    b, n = 2, 63

    key = jax.random.PRNGKey(0)
    k_xyz, k_feat, k_param = jax.random.split(key, 3)
    xyz = jax.random.normal(k_xyz, (b, n, 3), jnp.float32)
    features = jax.random.normal(k_feat, (b, n, in_planes), jnp.float32)
    params = init_params(k_param, in_planes, out_planes, share_planes)

    out = point_transformer_layer(xyz, features, params, share_planes, nsample,
                                  max_tile=32)
    out = jax.block_until_ready(out)
    assert out.shape == (b, n, out_planes)

    ref = jax.block_until_ready(
        reference_forward(xyz, features, params, share_planes, nsample))
    rel_err = float(np.max(np.abs(np.asarray(out) - np.asarray(ref)))
                    / (np.max(np.abs(np.asarray(ref))) + 1e-8))
    # loose tolerance: bf16 MXU projection inputs, one-pass BN stats and the
    # approx EUP reciprocal vs a HIGHEST-precision f32 XLA reference
    assert rel_err < 6e-2, f"mismatch vs reference: rel_err={rel_err}"

    print("KERNEL_OK")
</pallas_src>

<mosaic_0001>
module attributes {stable_mosaic.version = 11 : i64} {
  func.func @g1_stats_kernel(%arg0: i32, %arg1: i32, %arg2: memref<32x8xf32, #tpu.memory_space<vmem>>, %arg3: memref<256x8xf32, #tpu.memory_space<vmem>>, %arg4: memref<32x16xbf16, #tpu.memory_space<vmem>>, %arg5: memref<256x16xbf16, #tpu.memory_space<vmem>>, %arg6: memref<16x32xbf16, #tpu.memory_space<vmem>>, %arg7: memref<16x32xbf16, #tpu.memory_space<vmem>>, %arg8: memref<8x8xf32, #tpu.memory_space<vmem>>, %arg9: memref<1x8xf32, #tpu.memory_space<vmem>>, %arg10: memref<1x8xf32, #tpu.memory_space<vmem>>, %arg11: memref<8x32xf32, #tpu.memory_space<vmem>>, %arg12: memref<1x8x32xf32, #tpu.memory_space<vmem>>, %arg13: memref<1x8x32xf32, #tpu.memory_space<vmem>>) attributes {dimension_semantics = [#tpu.dimension_semantics<parallel>, #tpu.dimension_semantics<arbitrary>], iteration_bounds = array<i64: 2, 2>, scalar_prefetch = 0 : i64, scratch_operands = 0 : i64, tpu.core_type = #tpu.core_type<tc>, window_params = [{transform_indices = @transform_0, window_bounds = array<i64: 32, 8>}, {transform_indices = @transform_1, window_bounds = array<i64: 256, 8>}, {transform_indices = @transform_2, window_bounds = array<i64: 32, 16>}, {transform_indices = @transform_3, window_bounds = array<i64: 256, 16>}, {pipeline_mode = #tpu.pipeline_mode<synchronous>, transform_indices = @transform_4, window_bounds = array<i64: 16, 32>}, {pipeline_mode = #tpu.pipeline_mode<synchronous>, transform_indices = @transform_5, window_bounds = array<i64: 16, 32>}, {pipeline_mode = #tpu.pipeline_mode<synchronous>, transform_indices = @transform_6, window_bounds = array<i64: 8, 8>}, {pipeline_mode = #tpu.pipeline_mode<synchronous>, transform_indices = @transform_7, window_bounds = array<i64: 1, 8>}, {pipeline_mode = #tpu.pipeline_mode<synchronous>, transform_indices = @transform_8, window_bounds = array<i64: 1, 8>}, {pipeline_mode = #tpu.pipeline_mode<synchronous>, transform_indices = @transform_9, window_bounds = array<i64: 8, 32>}, {transform_indices = @transform_10, window_bounds = array<i64: 1, 8, 32>}, {transform_indices = @transform_11, window_bounds = array<i64: 1, 8, 32>}]} {
    %c0_i32 = arith.constant 0 : i32
    %0 = arith.cmpi eq, %arg1, %c0_i32 : i32
    %1 = arith.extui %0 : i1 to i32
    %c0_i32_0 = arith.constant 0 : i32
    %2 = arith.cmpi ne, %1, %c0_i32_0 : i32
    scf.if %2 {
      %cst_38 = arith.constant 0.000000e+00 : f32
      %62 = vector.broadcast %cst_38 : f32 to vector<1x8x32xf32>
      %c0_39 = arith.constant 0 : index
      %c0_40 = arith.constant 0 : index
      %c0_41 = arith.constant 0 : index
      %63 = vector.load %arg12[%c0_39, %c0_40, %c0_41] : memref<1x8x32xf32, #tpu.memory_space<vmem>>, vector<1x8x32xf32>
      tpu.vector_store %arg12[%c0_39, %c0_40, %c0_41], %62 {strides = array<i32>} : memref<1x8x32xf32, #tpu.memory_space<vmem>>, vector<1x8x32xf32>,
      %cst_42 = arith.constant 0.000000e+00 : f32
      %64 = vector.broadcast %cst_42 : f32 to vector<1x8x32xf32>
      %c0_43 = arith.constant 0 : index
      %c0_44 = arith.constant 0 : index
      %c0_45 = arith.constant 0 : index
      %65 = vector.load %arg13[%c0_43, %c0_44, %c0_45] : memref<1x8x32xf32, #tpu.memory_space<vmem>>, vector<1x8x32xf32>
      tpu.vector_store %arg13[%c0_43, %c0_44, %c0_45], %64 {strides = array<i32>} : memref<1x8x32xf32, #tpu.memory_space<vmem>>, vector<1x8x32xf32>,
    } else {
    }
    %c0 = arith.constant 0 : index
    %c0_1 = arith.constant 0 : index
    %3 = vector.load %arg4[%c0, %c0_1] : memref<32x16xbf16, #tpu.memory_space<vmem>>, vector<32x16xbf16>
    %c0_2 = arith.constant 0 : index
    %c0_3 = arith.constant 0 : index
    %4 = vector.load %arg6[%c0_2, %c0_3] : memref<16x32xbf16, #tpu.memory_space<vmem>>, vector<16x32xbf16>
    %cst = arith.constant dense<0.000000e+00> : vector<32x32xf32>
    %5 = tpu.matmul %3, %4, %cst {dimension_numbers = #tpu.dot_dimension_numbers<[1], [0], [0], [1], [0, 0, 1, 1], [], []>} : vector<32x16xbf16>, vector<16x32xbf16>, vector<32x32xf32> -> vector<32x32xf32>
    %c0_4 = arith.constant 0 : index
    %c0_5 = arith.constant 0 : index
    %6 = vector.load %arg5[%c0_4, %c0_5] : memref<256x16xbf16, #tpu.memory_space<vmem>>, vector<256x16xbf16>
    %c0_6 = arith.constant 0 : index
    %c0_7 = arith.constant 0 : index
    %7 = vector.load %arg7[%c0_6, %c0_7] : memref<16x32xbf16, #tpu.memory_space<vmem>>, vector<16x32xbf16>
    %cst_8 = arith.constant dense<0.000000e+00> : vector<256x32xf32>
    %8 = tpu.matmul %6, %7, %cst_8 {dimension_numbers = #tpu.dot_dimension_numbers<[1], [0], [0], [1], [0, 0, 1, 1], [], []>} : vector<256x16xbf16>, vector<16x32xbf16>, vector<256x32xf32> -> vector<256x32xf32>
    %c0_9 = arith.constant 0 : index
    %c0_10 = arith.constant 0 : index
    %9 = vector.load %arg2[%c0_9, %c0_10] : memref<32x8xf32, #tpu.memory_space<vmem>>, vector<32x8xf32>
    %c0_11 = arith.constant 0 : index
    %c0_12 = arith.constant 0 : index
    %10 = vector.load %arg3[%c0_11, %c0_12] : memref<256x8xf32, #tpu.memory_space<vmem>>, vector<256x8xf32>
    %c0_13 = arith.constant 0 : index
    %c0_14 = arith.constant 0 : index
    %11 = vector.load %arg8[%c0_13, %c0_14] : memref<8x8xf32, #tpu.memory_space<vmem>>, vector<8x8xf32>
    %c0_15 = arith.constant 0 : index
    %c0_16 = arith.constant 0 : index
    %12 = vector.load %arg9[%c0_15, %c0_16] : memref<1x8xf32, #tpu.memory_space<vmem>>, vector<1x8xf32>
    %c0_17 = arith.constant 0 : index
    %c0_18 = arith.constant 0 : index
    %13 = vector.load %arg10[%c0_17, %c0_18] : memref<1x8xf32, #tpu.memory_space<vmem>>, vector<1x8xf32>
    %c0_19 = arith.constant 0 : index
    %c0_20 = arith.constant 0 : index
    %14 = vector.load %arg11[%c0_19, %c0_20] : memref<8x32xf32, #tpu.memory_space<vmem>>, vector<8x32xf32>
    %15 = vector.shape_cast %9 : vector<32x8xf32> to vector<32x1x8xf32>
    %16 = vector.shape_cast %10 : vector<256x8xf32> to vector<32x8x8xf32>
    %17 = vector.broadcast %15 : vector<32x1x8xf32> to vector<32x8x8xf32>
    %18 = arith.subf %17, %16 : vector<32x8x8xf32>
    %19 = vector.shape_cast %18 : vector<32x8x8xf32> to vector<256x8xf32>
    %cst_21 = arith.constant dense<0.000000e+00> : vector<256x8xf32>
    %20 = tpu.matmul %19, %11, %cst_21 {dimension_numbers = #tpu.dot_dimension_numbers<[1], [0], [0], [1], [0, 0, 1, 1], [], []>} : vector<256x8xf32>, vector<8x8xf32>, vector<256x8xf32> -> vector<256x8xf32>
    %21 = vector.broadcast %12 : vector<1x8xf32> to vector<256x8xf32>
    %22 = arith.mulf %20, %21 : vector<256x8xf32>
    %23 = vector.broadcast %13 : vector<1x8xf32> to vector<256x8xf32>
    %24 = arith.addf %22, %23 : vector<256x8xf32>
    %cst_22 = arith.constant 0.000000e+00 : f32
    %25 = vector.broadcast %cst_22 : f32 to vector<256x8xf32>
    %26 = arith.maximumf %24, %25 : vector<256x8xf32>
    %cst_23 = arith.constant dense<0.000000e+00> : vector<256x32xf32>
    %27 = tpu.matmul %26, %14, %cst_23 {dimension_numbers = #tpu.dot_dimension_numbers<[1], [0], [0], [1], [0, 0, 1, 1], [], []>} : vector<256x8xf32>, vector<8x32xf32>, vector<256x32xf32> -> vector<256x32xf32>
    %28 = vector.shape_cast %5 : vector<32x32xf32> to vector<32x1x32xf32>
    %29 = vector.shape_cast %8 : vector<256x32xf32> to vector<32x8x32xf32>
    %30 = vector.broadcast %28 : vector<32x1x32xf32> to vector<32x8x32xf32>
    %31 = arith.subf %30, %29 : vector<32x8x32xf32>
    %32 = vector.shape_cast %31 : vector<32x8x32xf32> to vector<256x32xf32>
    %33 = arith.addf %32, %27 : vector<256x32xf32>
    %c2_i32 = arith.constant 2 : i32
    %34 = arith.muli %arg0, %c2_i32 : i32
    %35 = arith.addi %34, %arg1 : i32
    %c32_i32 = arith.constant 32 : i32
    %36 = arith.muli %35, %c32_i32 : i32
    %37 = tpu.iota {dimensions = array<i32: 0>} : vector<32x1xi32>
    %38 = vector.broadcast %36 : i32 to vector<32x1xi32>
    %39 = arith.addi %38, %37 : vector<32x1xi32>
    %c126_i32 = arith.constant 126 : i32
    %40 = vector.broadcast %c126_i32 : i32 to vector<32x1xi32>
    %41 = arith.cmpi slt, %39, %40 : vector<32x1xi32>
    %42 = arith.extui %41 : vector<32x1xi1> to vector<32x1xi32>
    %43 = arith.sitofp %42 : vector<32x1xi32> to vector<32x1xf32>
    %44 = vector.shape_cast %33 : vector<256x32xf32> to vector<32x8x32xf32>
    %45 = vector.shape_cast %43 : vector<32x1xf32> to vector<32x1x1xf32>
    %46 = vector.broadcast %45 : vector<32x1x1xf32> to vector<32x8x32xf32>
    %47 = arith.mulf %44, %46 : vector<32x8x32xf32>
    %48 = vector.shape_cast %47 : vector<32x8x32xf32> to vector<256x32xf32>
    %c0_24 = arith.constant 0 : index
    %c0_25 = arith.constant 0 : index
    %c0_26 = arith.constant 0 : index
    %49 = vector.load %arg12[%c0_24, %c0_25, %c0_26] : memref<1x8x32xf32, #tpu.memory_space<vmem>>, vector<1x8x32xf32>
    %cst_27 = arith.constant dense<0.000000e+00> : vector<32xf32>
    %50 = vector.multi_reduction <add>, %48, %cst_27 [0] : vector<256x32xf32> to vector<32xf32>
    %51 = vector.shape_cast %50 : vector<32xf32> to vector<1x1x32xf32>
    %52 = vector.broadcast %51 : vector<1x1x32xf32> to vector<1x8x32xf32>
    %53 = arith.addf %49, %52 : vector<1x8x32xf32>
    %c0_28 = arith.constant 0 : index
    %c0_29 = arith.constant 0 : index
    %c0_30 = arith.constant 0 : index
    %54 = vector.load %arg12[%c0_28, %c0_29, %c0_30] : memref<1x8x32xf32, #tpu.memory_space<vmem>>, vector<1x8x32xf32>
    tpu.vector_store %arg12[%c0_28, %c0_29, %c0_30], %53 {strides = array<i32>} : memref<1x8x32xf32, #tpu.memory_space<vmem>>, vector<1x8x32xf32>,
    %c0_31 = arith.constant 0 : index
    %c0_32 = arith.constant 0 : index
    %c0_33 = arith.constant 0 : index
    %55 = vector.load %arg13[%c0_31, %c0_32, %c0_33] : memref<1x8x32xf32, #tpu.memory_space<vmem>>, vector<1x8x32xf32>
    %56 = arith.mulf %48, %48 : vector<256x32xf32>
    %cst_34 = arith.constant dense<0.000000e+00> : vector<32xf32>
    %57 = vector.multi_reduction <add>, %56, %cst_34 [0] : vector<256x32xf32> to vector<32xf32>
    %58 = vector.shape_cast %57 : vector<32xf32> to vector<1x1x32xf32>
    %59 = vector.broadcast %58 : vector<1x1x32xf32> to vector<1x8x32xf32>
    %60 = arith.addf %55, %59 : vector<1x8x32xf32>
    %c0_35 = arith.constant 0 : index
    %c0_36 = arith.constant 0 : index
    %c0_37 = arith.constant 0 : index
    %61 = vector.load %arg13[%c0_35, %c0_36, %c0_37] : memref<1x8x32xf32, #tpu.memory_space<vmem>>, vector<1x8x32xf32>
    tpu.vector_store %arg13[%c0_35, %c0_36, %c0_37], %60 {strides = array<i32>} : memref<1x8x32xf32, #tpu.memory_space<vmem>>, vector<1x8x32xf32>,
    return
  }
  func.func @transform_0(%arg0: i32, %arg1: i32) -> (i32, i32) {
    %c2_i32 = arith.constant 2 : i32
    %0 = arith.muli %arg0, %c2_i32 : i32
    %1 = arith.addi %0, %arg1 : i32
    %c0_i32 = arith.constant 0 : i32
    %c0_i32_0 = arith.constant 0 : i32
    return %1, %c0_i32 : i32, i32
  }
  func.func @transform_1(%arg0: i32, %arg1: i32) -> (i32, i32) {
    %c2_i32 = arith.constant 2 : i32
    %0 = arith.muli %arg0, %c2_i32 : i32
    %1 = arith.addi %0, %arg1 : i32
    %c0_i32 = arith.constant 0 : i32
    %c0_i32_0 = arith.constant 0 : i32
    return %1, %c0_i32 : i32, i32
  }
  func.func @transform_2(%arg0: i32, %arg1: i32) -> (i32, i32) {
    %c2_i32 = arith.constant 2 : i32
    %0 = arith.muli %arg0, %c2_i32 : i32
    %1 = arith.addi %0, %arg1 : i32
    %c0_i32 = arith.constant 0 : i32
    %c0_i32_0 = arith.constant 0 : i32
    return %1, %c0_i32 : i32, i32
  }
  func.func @transform_3(%arg0: i32, %arg1: i32) -> (i32, i32) {
    %c2_i32 = arith.constant 2 : i32
    %0 = arith.muli %arg0, %c2_i32 : i32
    %1 = arith.addi %0, %arg1 : i32
    %c0_i32 = arith.constant 0 : i32
    %c0_i32_0 = arith.constant 0 : i32
    return %1, %c0_i32 : i32, i32
  }
  func.func @transform_4(%arg0: i32, %arg1: i32) -> (i32, i32) {
    %c0_i32 = arith.constant 0 : i32
    %c0_i32_0 = arith.constant 0 : i32
    %c0_i32_1 = arith.constant 0 : i32
    return %c0_i32, %c0_i32_0 : i32, i32
  }
  func.func @transform_5(%arg0: i32, %arg1: i32) -> (i32, i32) {
    %c0_i32 = arith.constant 0 : i32
    %c0_i32_0 = arith.constant 0 : i32
    %c0_i32_1 = arith.constant 0 : i32
    return %c0_i32, %c0_i32_0 : i32, i32
  }
  func.func @transform_6(%arg0: i32, %arg1: i32) -> (i32, i32) {
    %c0_i32 = arith.constant 0 : i32
    %c0_i32_0 = arith.constant 0 : i32
    %c0_i32_1 = arith.constant 0 : i32
    return %c0_i32, %c0_i32_0 : i32, i32
  }
  func.func @transform_7(%arg0: i32, %arg1: i32) -> (i32, i32) {
    %c0_i32 = arith.constant 0 : i32
    %c0_i32_0 = arith.constant 0 : i32
    %c0_i32_1 = arith.constant 0 : i32
    return %c0_i32, %c0_i32_0 : i32, i32
  }
  func.func @transform_8(%arg0: i32, %arg1: i32) -> (i32, i32) {
    %c0_i32 = arith.constant 0 : i32
    %c0_i32_0 = arith.constant 0 : i32
    %c0_i32_1 = arith.constant 0 : i32
    return %c0_i32, %c0_i32_0 : i32, i32
  }
  func.func @transform_9(%arg0: i32, %arg1: i32) -> (i32, i32) {
    %c0_i32 = arith.constant 0 : i32
    %c0_i32_0 = arith.constant 0 : i32
    %c0_i32_1 = arith.constant 0 : i32
    return %c0_i32, %c0_i32_0 : i32, i32
  }
  func.func @transform_10(%arg0: i32, %arg1: i32) -> (i32, i32, i32) {
    %c0_i32 = arith.constant 0 : i32
    %c0_i32_0 = arith.constant 0 : i32
    %c0_i32_1 = arith.constant 0 : i32
    return %arg0, %c0_i32, %c0_i32_0 : i32, i32, i32
  }
  func.func @transform_11(%arg0: i32, %arg1: i32) -> (i32, i32, i32) {
    %c0_i32 = arith.constant 0 : i32
    %c0_i32_0 = arith.constant 0 : i32
    %c0_i32_1 = arith.constant 0 : i32
    return %arg0, %c0_i32, %c0_i32_0 : i32, i32, i32
  }
}

</mosaic_0001>

<bundles_post_ra>
// kernel: tpu_custom_call.1
= control target key start
LH: loop header
LB: loop body
LE: loop exit
PB: predicated region body
PF: predicated region fallthrough
CT: control target
= control target key end

     0   :  { %s4808_s0 = inlined_call_operand.vmem [shape: f32[128,8], index: 0, kind: input, shape index: {}]   ;;  %s4809_s1 = inlined_call_operand.vmem [shape: f32[1024,8], index: 1, kind: input, shape index: {}]   ;;  %s4810_s2 = inlined_call_operand.vmem [shape: bf16[128,16], index: 2, kind: input, shape index: {}]   ;;  %s4811_s3 = inlined_call_operand.vmem [shape: bf16[1024,16], index: 3, kind: input, shape index: {}]   ;;  %s4812_s4 = inlined_call_operand.vmem [shape: bf16[16,32], index: 4, kind: input, shape index: {}]   ;;  %s4813_s5 = inlined_call_operand.vmem [shape: bf16[16,32], index: 5, kind: input, shape index: {}]   ;;  %s4814_s6 = inlined_call_operand.vmem [shape: f32[8,8], index: 6, kind: input, shape index: {}]   ;;  %s4815_s7 = inlined_call_operand.vmem [shape: f32[1,8], index: 7, kind: input, shape index: {}]   ;;  %s4816_s8 = inlined_call_operand.vmem [shape: f32[1,8], index: 8, kind: input, shape index: {}]   ;;  %s4817_s9 = inlined_call_operand.vmem [shape: f32[8,32], index: 9, kind: input, shape index: {}]   ;;  %s4818_s10 = inlined_call_operand.hbm [shape: f32[2,8,32], index: 10, kind: output, shape index: {0}]   ;;  %s4819_s11 = inlined_call_operand.hbm [shape: f32[2,8,32], index: 11, kind: output, shape index: {1}]  }
   0x1   :  { %4850 = sst [smem:[#allocation39_spill]] %s4818_s10 }
   0x2   :  { %4851 = sst [smem:[#allocation40_spill]] %s4819_s11 }
   0x3   :  { %17 = vsyncpa [#allocation3], 0 }
   0x4   :  { %19 = vsyncpa [#allocation3 + $0x1], 0 }
   0x5   :  { %20 = vsyncpa [#allocation5], 0 }
   0x6   :  { %22 = vsyncpa [#allocation5 + $0x1], 0  ;;  %s3786_s17 = smov 0   ;;  %s3788_s18 = smov 0  }
   0x7   :  { %s3790_s19 = smov 0   ;;  %s3792_s20 = smov 0  }
   0x8   :  { %s3794_s21 = smov 0   ;;  %s3796_s22 = smov 0  }
   0x9   :  { %s3798_s23 = smov 0   ;;  %s3800_s24 = smov 0  }
   0xa LB: > { %4852 = sst [smem:[#allocation8_spill]] %s3691_s17  ;;  %s3122_s25 = sadd.s32 4294967295, %s3719_s24   ;;  %s3719_s24 = sphi %s3800_s24, %s28_s24   ;;  %s3715_s23 = sphi %s3798_s23, %s4935_s23   ;;  %s3711_s22 = sphi %s3796_s22, %s4934_s22   ;;  %s3707_s21 = sphi %s3794_s21, %s4933_s21   ;;  %s3703_s20 = sphi %s3792_s20, %s4932_s20   ;;  %s3699_s19 = sphi %s3790_s19, %s4931_s19   ;;  %s3695_s18 = sphi %s3788_s18, %s4930_s18   ;;  %s3691_s17 = sphi %s3786_s17, %s4929_s17  }
   0xb   : > { %4853 = sst [smem:[#allocation9_spill]] %s3695_s18  ;;  %s3123_s26 = sadd.s32 4294967294, %s3719_s24  }
   0xc   : > { %4854 = sst [smem:[#allocation10_spill]] %s3699_s19  ;;  %s37_s27 = sadd.s32 1, %s3711_s22 }
   0xd   : > { %4855 = sst [smem:[#allocation11_spill]] %s3707_s21  ;;  %p38_p0 = scmp.ge.s32.totalorder %s37_s27, 2 }
   0xe   : > { %4856 = sst [smem:[#allocation12_spill]] %s3711_s22  ;;  %s40_s28 = sadd.s32 1, %s3715_s23 }
   0xf   : > { %4857 = sst [smem:[#allocation13_spill]] %s3715_s23  ;;  %p303_p1 = scmp.ne.s32.totalorder %s3699_s19, %s3695_s18 }
  0x10   : > { %4858 = sst [smem:[#allocation14_spill]] %s3719_s24  ;;  %p304_p2 = scmp.eq.s32.totalorder %s3122_s25, 3 }
  0x11   : > { %s4937_s27 = smov (%p38_p0, %s37_s27), 0  ;;  %s4939_s28 = smov (!%p38_p0, %s40_s28), %s3715_s23 }
  0x12   : > { %4859 = sst [smem:[#allocation15_spill]] %s4937_s27  ;;  %p3835_p3 = por %p304_p2, %p303_p1 }
  0x13   : > { %p309_p4 = scmp.ne.s32.totalorder %s3695_s18, %s3691_s17  ;;  %p42_p5 = scmp.ge.s32.totalorder %s4939_s28, 2 }
  0x14   : > { %s4860_s29 = scalar_select %p3835_p3, 1, 0 }
  0x15   : > { %p310_p6 = scmp.eq.s32.totalorder %s3123_s26, 3  ;;  %p3134_p7 = scmp.ge.s32.totalorder %s3719_s24, 1 }
  0x16   : > { %4861 = sst [smem:[#allocation16_spill]] %s4860_s29  ;;  %p424_p8 = scmp.lt.s32.totalorder %s3719_s24, 5 }
  0x17   : > { %s4941_s28 = smov (%p42_p5, %s4939_s28), 0  ;;  %p3845_p9 = por %p310_p6, %p309_p4 }
  0x18   : > { %4862 = sst [smem:[#allocation17_spill]] %s4941_s28  ;;  %p425_p10 = pnand %p3134_p7, %p424_p8 }
  0x19   : > { %s4863_s30 = scalar_select %p3845_p9, 1, 0 }
  0x1a   : > { %s290_s12 = ssub.s32 %s3715_s23, %s4941_s28  ;;  %s293_s13 = sadd.s32 1, %s3699_s19 }
  0x1b   : > { %4864 = sst [smem:[#allocation18_spill]] %s4863_s30  ;;  %p291_p11 = scmp.eq.s32.totalorder %s290_s12, 0 }
  0x1c   : > { %428 = sbr.rel (%p425_p10) target bundleno = 587 (0x24b), region = 60 }
  0x1d   : > { %s3853_s14 = scalar_select %p291_p11, %s3699_s19, %s293_s13  }
  0x1f   : > { %4865 = sst [smem:[#allocation19_spill]] %s3853_s14 }
  0x21   : > { %s3856_s15 = sand.u32 1, %s3695_s18   ;;  %s3137_s16 = sshll.u32 %s3707_s21, 1 }
  0x22   : > { %4866 = sst [smem:[#allocation20_spill]] %s3856_s15  ;;  %s3135_s25 = sshll.u32 %s3856_s15, 3 }
  0x23   : > { %s493_s26 = sadd.s32 %s3703_s20, %s3137_s16  ;;  %s3883_s21 = scalar_lea.vmem [#allocation2], %s3135_s25 }
  0x24   : > { %s3138_s27 = sshll.u32 %s493_s26, 2  ;;  %s3861_s22 = sshll.u32 %s493_s26, 5 }
  0x25   : > { %p495_p12 = scmp.lt.s32.totalorder %s3138_s27, 15  ;;  %p505_p13 = scmp.lt.s32.totalorder %s3861_s22, 127 }
  0x26   : > { %s3885_s23 = scalar_lea.vmem [#allocation4], %s3135_s25  ;;  %p3149_p0 = scmp.ne.s32.totalorder %s3703_s20, 0 }
  0x27   : > { %s4943_s27 = smov (!%p495_p12, %s3138_s27), 15 }
  0x28   : > { %s506_s12 = scalar_select %p505_p13, %s3861_s22, 127 }
  0x29   : > { %s3139_s13 = sshll.u32 %s4943_s27, 3  ;;  %s3145_s28 = sshll.u32 %s4943_s27, 2 }
  0x2a   : > { %s3868_s19 = scalar_lea.vmem %s4808_s0, %s3139_s13  ;;  %s3142_s18 = sshll.u32 %s506_s12, 3 }
  0x2b   : > { %s3873_s16 = scalar_lea.vmem %s4809_s1, %s3142_s18  ;;  %s518_s11 = scalar_lea.vmem %s4810_s2, %s3145_s28 }
  0x2c   : > { %s3148_s10 = sshll.u32 %s506_s12, 2  ;;  %536 = sbr.rel (%p3149_p0) target bundleno = 51 (0x33), region = 64 }
  0x2d   : > { %s3881_s27 = scalar_lea.vmem %s4811_s3, %s3148_s10 }
  0x31   : > { %vm537_vm0 = vcmask 261120   ;;  %v3721_v0 = vmov 0.0  }
  0x32   : > { %538 = vst.msk [vmem:[%s3883_s21] sm:$0xff] %vm537_vm0, %v3721_v0  ;;  %539 = vst.msk [vmem:[%s3885_s23] sm:$0xff] %vm537_vm0, %v3721_v0 }
  0x33 PF: > { %v3573_v1 = vld [vmem:[%s4812_s4] sm:$0xff]   ;;  %vm562_vm1 = vcmask 130048   ;;  %v3577_v5 = vld [vmem:[%s518_s11 + $0x8] sm:$0xff]   ;;  %v995_v7 = vlaneseq  ;;  %v3579_v9 = vld [vmem:[%s3881_s27 + $0x10] sm:$0xff]   ;;  %v3722_v10 = vmov 1966171168  }
  0x34   : > { %v3574_v2 = vld [vmem:[%s4813_s5] sm:$0xff]   ;;  %3352 = vmatprep.subr.bf16.mxu0 %v3573_v1  ;;  %v3578_v6 = vld [vmem:[%s3881_s27 + $0x8] sm:$0xff]   ;;  %v993_v11 = vunpack.c.l.s4 %v3722_v10  ;;  %v3580_v14 = vld [vmem:[%s3881_s27 + $0x18] sm:$0xff]   ;;  %vm1379_vm2 = vcmask 64512   ;;  %vm2776_vm5 = vcmask 261120   ;;  %s4921_s25 = sld [smem:[#allocation20_spill]] }
  0x35   : > { %v3575_v3 = vld [vmem:[%s518_s11] sm:$0xff]   ;;  %3358 = vmatprep.subr.bf16.mxu1 %v3574_v2  ;;  %3353 = vmatpush3.bf16.msra.mxu0 %v3573_v1  ;;  %v3907_v12 = vshrl.u32 %v995_v7, 7  ;;  %v948_v25 = vld [vmem:[%s3868_s19 + $0x8] sm:$0xff]  ;;  %v953_v31 = vld [vmem:[%s3873_s16 + $0x10] sm:$0xff]  ;;  %s2971_s13 = sshll.u32 %s3883_s21, 4  ;;  %s2984_s26 = sshll.u32 %s3885_s23, 4  ;;  %s4725_s13 = int_to_ptr.vmem [resolvable:$true] %s2971_s13  ;;  %s4734_s26 = int_to_ptr.vmem [resolvable:$true] %s2984_s26 }
  0x36   : > { %v3576_v4 = vld [vmem:[%s3881_s27] sm:$0xff]   ;;  %3359 = vmatpush3.bf16.msra.mxu1 %v3574_v2  ;;  %3354 = vmatprep.mubr.msk.bf16.mxu0 %vm562_vm1, %v3575_v3  ;;  %v994_v15 = vunpack.c.0.s8 %v993_v11  ;;  %v952_v29 = vld [vmem:[%s3873_s16 + $0x8] sm:$0xff]  ;;  %v3584_v35 = vld [vmem:[%s3881_s27 + $0x30] sm:$0xff]   ;;  %v1040_v48 = vcombine.high %v948_v25, %v948_v25  ;;  %s4923_s18 = sld [smem:[#allocation39_spill]]  ;;  %s3597_s30 = scalar_lea.vmem %s4725_s13, 128 }
  0x37   : > { %3360 = vmatprep.mubr.msk.bf16.mxu1 %vm562_vm1, %v3576_v4  ;;  %v983_v8 = vld [vmem:[%s4814_s6] sm:$0xff]  ;;  %v3918_v20 = vsub.s32 0, %v3907_v12  ;;  %v3582_v33 = vld [vmem:[%s3881_s27 + $0x28] sm:$0xff]   ;;  %v954_v41 = vld [vmem:[%s3873_s16 + $0x18] sm:$0xff]  ;;  %s4925_s11 = sld [smem:[#allocation40_spill]]  ;;  %p3598_p1 = scmp.ne.s32.totalorder %s4725_s13, %s3597_s30 }
  0x38   : > { %3355 = vmatmul.mubr.msk.bf16.vlgmr.msra.gmra.mxu0 %vm562_vm1, %v3577_v5  ;;  %3392 = vmatprep.subr.mxu0 %v983_v8  ;;  %v947_v13 = vld [vmem:[%s3868_s19] sm:$0xff]  ;;  %v3913_v18 = vsub.s32 %v994_v15, %v3907_v12  ;;  %v956_v54 = vld [vmem:[%s3873_s16 + $0x28] sm:$0xff]  ;;  %v957_v55 = vld [vmem:[%s3873_s16 + $0x30] sm:$0xff]  ;;  %s3724_s14 = smov [#allocation2]  }
  0x39   : > { %3361 = vmatmul.mubr.msk.bf16.vlgmr.msra.gmra.mxu1 %vm562_vm1, %v3578_v6  ;;  %3393 = vmatpush3.msra.mxu0 %v983_v8  ;;  %v991_v16 = vcombine.high %v947_v13, %v947_v13  ;;  %v3581_v17 = vld [vmem:[%s3881_s27 + $0x20] sm:$0xff]   ;;  %v3585_v58 = vld [vmem:[%s3881_s27 + $0x38] sm:$0xff]   ;;  %v960_v11 = vld [vmem:[%s3873_s16 + $0x48] sm:$0xff]  ;;  %p3599_p2 = pnand %p3598_p1, %p3835_p3  ;;  %s3601_s15 = sshll.u32 %s3724_s14, 4  ;;  %s3602_s15 = int_to_ptr.vmem [resolvable:$false] %s3601_s15 }
  0x3a   : > { %3364 = vmatprep.mubr.msk.bf16.mxu1 %vm562_vm1, %v3579_v9  ;;  %v998_v19 = vrot.slane %v947_v13, %v3913_v18  ;;  %v951_v26 = vld [vmem:[%s3873_s16] sm:$0xff]  ;;  %v1047_v36 = vrot.slane %v948_v25, %v3913_v18  ;;  %v1054_v63 = vrot.slane %v1040_v48, %v3913_v18  ;;  %v958_v1 = vld [vmem:[%s3873_s16 + $0x38] sm:$0xff]  ;;  %v949_v15 = vld [vmem:[%s3868_s19 + $0x10] sm:$0xff]  ;;  %p3604_p5 = scmp.lt.s32.totalorder %s4725_s13, %s3602_s15 }
  0x3b   : > { %v1005_v21 = vrot.slane %v991_v16, %v3913_v18  ;;  %v955_v47 = vld [vmem:[%s3873_s16 + $0x20] sm:$0xff]  ;;  %v961_v16 = vld [vmem:[%s3873_s16 + $0x50] sm:$0xff]  ;;  %p3600_p4 = pneg %p3599_p2 }
  0x3c   : > { %v1006_v22 = vcombine.high %v998_v19, %v998_v19  ;;  %v1014_v23 = vrot.slane %v998_v19, %v3913_v18  ;;  %v1055_v52 = vcombine.high %v1047_v36, %v1047_v36  ;;  %v1063_v57 = vrot.slane %v1047_v36, %v3913_v18  ;;  %v3586_v59 = vld [vmem:[%s3881_s27 + $0x40] sm:$0xff]   ;;  %v3589_v19 = vld [vmem:[%s3881_s27 + $0x50] sm:$0xff]   ;;  %v964_v36 = vld [vmem:[%s3873_s16 + $0x68] sm:$0xff]  ;;  %s4924_s10 = smov %s4923_s18 }
  0x3d   : > { %v1007_v24 = vcombine.high %v1005_v21, %v1005_v21  ;;  %v1021_v27 = vrot.slane %v1005_v21, %v3913_v18  ;;  %v959_v4 = vld [vmem:[%s3873_s16 + $0x40] sm:$0xff]  ;;  %v1056_v9 = vcombine.high %v1054_v63, %v1054_v63 }
  0x3e   : > { %v1190_v28 = vrot.slane %v1014_v23, %v3918_v20  ;;  %v1028_v30 = vrot.slane %v1006_v22, %v3913_v18  ;;  %v1036_v32 = vcombine.high %v1014_v23, %v1014_v23  ;;  %v1077_v62 = vrot.slane %v1055_v52, %v3913_v18  ;;  %v986_v5 = vld [vmem:[%s4817_s9] sm:$0xff] }
  0x3f   : > { %v1035_v34 = vrot.slane %v1007_v24, %v3913_v18  ;;  %v1206_v42 = vrot.slane %v1021_v27, %v3918_v20  ;;  %v1037_v43 = vcombine.high %v1021_v27, %v1021_v27  ;;  %v1222_v2 = vrot.slane %v1063_v57, %v3918_v20  ;;  %3442 = vmatprep.subr.mxu0 %v986_v5 }
  0x40   : > { %v1347_v37 = vsub.f32 %v1190_v28, %v951_v26  ;;  %v1194_v38 = vrot.slane %v1028_v30, %v3918_v20  ;;  %v1198_v39 = vrot.slane %v1036_v32, %v3918_v20  ;;  %v1038_v40 = vcombine.high %v1028_v30, %v1028_v30  ;;  %v962_v26 = vld [vmem:[%s3873_s16 + $0x58] sm:$0xff]  ;;  %3492 = vmatprep.subr.mxu1 %v986_v5 }
  0x41   : > { %3365 = vmatmul.mubr.msk.bf16.gmra.mxu1 %vm562_vm1, %v3580_v14  ;;  %v1210_v50 = vrot.slane %v1035_v34, %v3918_v20  ;;  %v1039_v51 = vcombine.high %v1035_v34, %v1035_v34  ;;  %v1351_v53 = vsub.f32 %v1206_v42, %v955_v47  ;;  %v1214_v56 = vrot.slane %v1037_v43, %v3918_v20  ;;  %v966_v47 = vld [vmem:[%s3873_s16 + $0x78] sm:$0xff] }
  0x42   : > { %3368 = vmatprep.mubr.msk.bf16.mxu1 %vm562_vm1, %v3581_v17  ;;  %3394 = vmatprep.mubr.msk.f32.mxu0 %vm1379_vm2, %v1347_v37  ;;  %v1348_v44 = vsub.f32 %v1194_v38, %v952_v29  ;;  %v1349_v45 = vsub.f32 %v1198_v39, %v953_v31  ;;  %v1202_v46 = vrot.slane %v1038_v40, %v3918_v20  ;;  %v3587_v17 = vld [vmem:[%s3881_s27 + $0x48] sm:$0xff]   ;;  %v963_v29 = vld [vmem:[%s3873_s16 + $0x60] sm:$0xff]  ;;  %v965_v39 = vld [vmem:[%s3873_s16 + $0x70] sm:$0xff] }
  0x43   : > { %v1352_v60 = vsub.f32 %v1210_v50, %v956_v54  ;;  %v1218_v61 = vrot.slane %v1039_v51, %v3918_v20  ;;  %v1353_v0 = vsub.f32 %v1214_v56, %v957_v55  ;;  %v1085_v3 = vcombine.high %v1063_v57, %v1063_v57  ;;  %3493 = vmatpush3.msra.mxu1 %v986_v5  ;;  %v3590_v40 = vld [vmem:[%s3881_s27 + $0x58] sm:$0xff]   ;;  %v967_v50 = vld [vmem:[%s3873_s16 + $0x80] sm:$0xff]  ;;  %v968_v56 = vld [vmem:[%s3873_s16 + $0x88] sm:$0xff] }
  0x44   : > { %3395 = vmatmul.mubr.msk.f32.vlgmr.msra.gmra.mxu0 %vm1379_vm2, %v1348_v44  ;;  %v1350_v49 = vsub.f32 %v1202_v46, %v954_v41  ;;  %v1226_v7 = vrot.slane %v1077_v62, %v3918_v20  ;;  %v1087_v8 = vcombine.high %v1077_v62, %v1077_v62  ;;  %v1355_v10 = vsub.f32 %v1222_v2, %v959_v4  ;;  %v3591_v41 = vld [vmem:[%s3881_s27 + $0x60] sm:$0xff]   ;;  %v970_v4 = vld [vmem:[%s3873_s16 + $0x98] sm:$0xff] }
  0x45   : > { %3397 = vmatprep.mubr.msk.f32.mxu0 %vm1379_vm2, %v1349_v45  ;;  %v1354_v6 = vsub.f32 %v1218_v61, %v958_v1  ;;  %v1230_v13 = vrot.slane %v1085_v3, %v3918_v20  ;;  %v1070_v14 = vrot.slane %v1054_v63, %v3913_v18  ;;  %3443 = vmatpush3.msra.mxu0 %v986_v5  ;;  %v3592_v61 = vld [vmem:[%s3881_s27 + $0x68] sm:$0xff]   ;;  %v3594_v63 = vld [vmem:[%s3881_s27 + $0x70] sm:$0xff]  }
  0x46   : > { %v1356_v21 = vsub.f32 %v1226_v7, %v960_v11  ;;  %v1234_v22 = vrot.slane %v1087_v8, %v3918_v20  ;;  %v1084_v23 = vrot.slane %v1056_v9, %v3913_v18  ;;  %v1096_v24 = vrot.slane %v949_v15, %v3913_v18  ;;  %v971_v7 = vld [vmem:[%s3873_s16 + $0xa0] sm:$0xff] }
  0x47   : > { %v1357_v25 = vsub.f32 %v1230_v13, %v961_v16  ;;  %v1238_v27 = vrot.slane %v1070_v14, %v3918_v20  ;;  %v1086_v28 = vcombine.high %v1070_v14, %v1070_v14  ;;  %v1089_v30 = vcombine.high %v949_v15, %v949_v15  ;;  %v972_v15 = vld [vmem:[%s3873_s16 + $0xa8] sm:$0xff] }
  0x48   : > { %3398 = vmatmul.mubr.msk.f32.gmra.mxu0 %vm1379_vm2, %v1350_v49  ;;  %v1358_v31 = vsub.f32 %v1234_v22, %v962_v26  ;;  %v1242_v32 = vrot.slane %v1084_v23, %v3918_v20  ;;  %v1104_v34 = vcombine.high %v1096_v24, %v1096_v24  ;;  %v1112_v38 = vrot.slane %v1096_v24, %v3913_v18 }
  0x49   : > { %3369 = vmatmul.mubr.msk.bf16.gmra.mxu1 %vm562_vm1, %v3582_v33  ;;  %3400 = vmatprep.mubr.msk.f32.mxu0 %vm1379_vm2, %v1351_v53  ;;  %v1088_v33 = vcombine.high %v1084_v23, %v1084_v23  ;;  %v1246_v37 = vrot.slane %v1086_v28, %v3918_v20  ;;  %v1103_v42 = vrot.slane %v1089_v30, %v3913_v18  ;;  %v975_v30 = vld [vmem:[%s3873_s16 + $0xc0] sm:$0xff] }
  0x4a   : > { %3372 = vmatprep.mubr.msk.bf16.mxu1 %vm562_vm1, %v3584_v35  ;;  %v1359_v35 = vsub.f32 %v1238_v27, %v963_v29  ;;  %v1360_v43 = vsub.f32 %v1242_v32, %v964_v36  ;;  %v1126_v45 = vrot.slane %v1104_v34, %v3913_v18  ;;  %v1254_v48 = vrot.slane %v1112_v38, %v3918_v20  ;;  %v974_v27 = vld [vmem:[%s3873_s16 + $0xb8] sm:$0xff]  ;;  %v976_v36 = vld [vmem:[%s3873_s16 + $0xc8] sm:$0xff] }
  0x4b   : > { %v1250_v44 = vrot.slane %v1088_v33, %v3918_v20  ;;  %v1361_v46 = vsub.f32 %v1246_v37, %v965_v39  ;;  %v1134_v49 = vcombine.high %v1112_v38, %v1112_v38  ;;  %v1105_v51 = vcombine.high %v1103_v42, %v1103_v42  ;;  %v977_v39 = vld [vmem:[%s3873_s16 + $0xd0] sm:$0xff] }
  0x4c   : > { %3401 = vmatmul.mubr.msk.f32.gmra.mxu0 %vm1379_vm2, %v1352_v60  ;;  %v1258_v53 = vrot.slane %v1126_v45, %v3918_v20  ;;  %v1136_v54 = vcombine.high %v1126_v45, %v1126_v45  ;;  %v1363_v55 = vsub.f32 %v1254_v48, %v967_v50  ;;  %v969_v60 = vld [vmem:[%s3873_s16 + $0x90] sm:$0xff] }
  0x4d   : > { %3403 = vmatprep.mubr.msk.f32.mxu0 %vm1379_vm2, %v1353_v0  ;;  %v1362_v52 = vsub.f32 %v1250_v44, %v966_v47  ;;  %v1262_v57 = vrot.slane %v1134_v49, %v3918_v20  ;;  %v1133_v62 = vrot.slane %v1105_v51, %v3913_v18  ;;  %v978_v44 = vld [vmem:[%s3873_s16 + $0xd8] sm:$0xff]  ;;  %v979_v47 = vld [vmem:[%s3873_s16 + $0xe0] sm:$0xff] }
  0x4e   : > { %v1364_v0 = vsub.f32 %v1258_v53, %v968_v56  ;;  %v1266_v1 = vrot.slane %v1136_v54, %v3918_v20  ;;  %v981_v54 = vld [vmem:[%s3873_s16 + $0xf0] sm:$0xff] }
  0x4f   : > { %v1365_v3 = vsub.f32 %v1262_v57, %v969_v60  ;;  %v1274_v8 = vrot.slane %v1133_v62, %v3918_v20 }
  0x50   : > { %3404 = vmatmul.mubr.msk.f32.gmra.mxu0 %vm1379_vm2, %v1354_v6  ;;  %v1366_v9 = vsub.f32 %v1266_v1, %v970_v4 }
  0x51   : > { %3373 = vmatmul.mubr.msk.bf16.gmra.mxu1 %vm562_vm1, %v3585_v58  ;;  %3406 = vmatprep.mubr.msk.f32.mxu0 %vm1379_vm2, %v1355_v10  ;;  %v1119_v58 = vrot.slane %v1103_v42, %v3913_v18  ;;  %v1137_v10 = vcombine.high %v1133_v62, %v1133_v62  ;;  %v1368_v22 = vsub.f32 %v1274_v8, %v972_v15 }
  0x52   : > { %3376 = vmatprep.mubr.msk.bf16.mxu1 %vm562_vm1, %v3586_v59  ;;  %v950_v59 = vld [vmem:[%s3868_s19 + $0x18] sm:$0xff]  ;;  %s2953_s19 = scalar_lea.sflag [#allocation3], %s4921_s25 }
  0x53   : > { %v1145_v2 = vrot.slane %v950_v59, %v3913_v18  ;;  %v1270_v5 = vrot.slane %v1119_v58, %v3918_v20  ;;  %v1135_v6 = vcombine.high %v1119_v58, %v1119_v58  ;;  %v1138_v13 = vcombine.high %v950_v59, %v950_v59  ;;  %v982_v58 = vld [vmem:[%s3873_s16 + $0xf8] sm:$0xff] }
  0x54   : > { %3407 = vmatmul.mubr.msk.f32.gmra.mxu0 %vm1379_vm2, %v1356_v21  ;;  %v3595_v21 = vld [vmem:[%s3881_s27 + $0x78] sm:$0xff]   ;;  %v1282_v23 = vrot.slane %v1137_v10, %v3918_v20 }
  0x55   : > { %3409 = vmatprep.mubr.msk.f32.mxu0 %vm1379_vm2, %v1357_v25  ;;  %v1153_v11 = vcombine.high %v1145_v2, %v1145_v2  ;;  %v1367_v14 = vsub.f32 %v1270_v5, %v971_v7  ;;  %v1278_v16 = vrot.slane %v1135_v6, %v3918_v20  ;;  %v1152_v25 = vrot.slane %v1138_v13, %v3913_v18 }
  0x57   : > { %v1175_v24 = vrot.slane %v1153_v11, %v3913_v18  ;;  %v1154_v34 = vcombine.high %v1152_v25, %v1152_v25  ;;  %v1168_v38 = vrot.slane %v1152_v25, %v3913_v18 }
  0x58   : > { %3410 = vmatmul.mubr.msk.f32.gmra.mxu0 %vm1379_vm2, %v1358_v31  ;;  %v1370_v31 = vsub.f32 %v1282_v23, %v974_v27 }
  0x59   : > { %3377 = vmatmul.mubr.msk.bf16.gmra.mxu1 %vm562_vm1, %v3587_v17  ;;  %3412 = vmatprep.mubr.msk.f32.mxu0 %vm1379_vm2, %v1359_v35  ;;  %v1161_v17 = vrot.slane %v1145_v2, %v3913_v18  ;;  %v1290_v32 = vrot.slane %v1175_v24, %v3918_v20  ;;  %v1185_v33 = vcombine.high %v1175_v24, %v1175_v24  ;;  %v4084_v2 = vld [vmem:[%s4816_s8] ss:$0 sm:$0xff] }
  0x5a   : > { %3380 = vmatprep.mubr.msk.bf16.mxu1 %vm562_vm1, %v3589_v19  ;;  %v973_v19 = vld [vmem:[%s3873_s16 + $0xb0] sm:$0xff]  ;;  %v1182_v42 = vrot.slane %v1154_v34, %v3913_v18  ;;  %v1302_v45 = vrot.slane %v1168_v38, %v3918_v20 }
  0x5b   : > { %v1369_v26 = vsub.f32 %v1278_v16, %v973_v19  ;;  %v1286_v28 = vrot.slane %v1161_v17, %v3918_v20  ;;  %v1183_v29 = vcombine.high %v1161_v17, %v1161_v17 }
  0x5c   : > { %3413 = vmatmul.mubr.msk.f32.gmra.mxu0 %vm1379_vm2, %v1360_v43  ;;  %v1306_v49 = vrot.slane %v1182_v42, %v3918_v20  ;;  %v1186_v50 = vcombine.high %v1182_v42, %v1182_v42  ;;  %v1375_v51 = vsub.f32 %v1302_v45, %v979_v47 }
  0x5d   : > { %3415 = vmatprep.mubr.msk.f32.mxu0 %vm1379_vm2, %v1361_v46  ;;  %v1371_v35 = vsub.f32 %v1286_v28, %v975_v30  ;;  %v1294_v37 = vrot.slane %v1183_v29, %v3918_v20  ;;  %v1184_v46 = vcombine.high %v1168_v38, %v1168_v38 }
  0x5e   : > { %v1314_v56 = vrot.slane %v1186_v50, %v3918_v20 }
  0x5f   : > { %v1373_v43 = vsub.f32 %v1294_v37, %v977_v39  ;;  %v1310_v53 = vrot.slane %v1184_v46, %v3918_v20 }
  0x60   : > { %3416 = vmatmul.mubr.msk.f32.gmra.mxu0 %vm1379_vm2, %v1362_v52  ;;  %v980_v52 = vld [vmem:[%s3873_s16 + $0xe8] sm:$0xff]  ;;  %v1378_v59 = vsub.f32 %v1314_v56, %v982_v58 }
  0x61   : > { %3381 = vmatmul.mubr.msk.bf16.gmra.mxu1 %vm562_vm1, %v3590_v40  ;;  %3418 = vmatprep.mubr.msk.f32.mxu0 %vm1379_vm2, %v1363_v55  ;;  %v1372_v40 = vsub.f32 %v1290_v32, %v976_v36  ;;  %v1376_v55 = vsub.f32 %v1306_v49, %v980_v52  ;;  %v1377_v57 = vsub.f32 %v1310_v53, %v981_v54 }
  0x62   : > { %3384 = vmatprep.mubr.msk.bf16.mxu1 %vm562_vm1, %v3591_v41  ;;  %v1298_v41 = vrot.slane %v1185_v33, %v3918_v20 }
  0x64   : > { %3419 = vmatmul.mubr.msk.f32.gmra.mxu0 %vm1379_vm2, %v1364_v0  ;;  %v1374_v48 = vsub.f32 %v1298_v41, %v978_v44  ;;  %v4079_v0 = vld [vmem:[%s4815_s7] ss:$0 sm:$0xff] }
  0x65   : > { %3421 = vmatprep.mubr.msk.f32.mxu0 %vm1379_vm2, %v1365_v3 }
  0x68   : > { %3422 = vmatmul.mubr.msk.f32.gmra.mxu0 %vm1379_vm2, %v1366_v9 }
  0x69   : > { %3385 = vmatmul.mubr.msk.bf16.gmra.mxu1 %vm562_vm1, %v3592_v61  ;;  %3424 = vmatprep.mubr.msk.f32.mxu0 %vm1379_vm2, %v1367_v14 }
  0x6a   : > { %3388 = vmatprep.mubr.msk.bf16.mxu1 %vm562_vm1, %v3594_v63 }
  0x6c   : > { %3425 = vmatmul.mubr.msk.f32.gmra.mxu0 %vm1379_vm2, %v1368_v22 }
  0x6d   : > { %3427 = vmatprep.mubr.msk.f32.mxu0 %vm1379_vm2, %v1369_v26 }
  0x70   : > { %3428 = vmatmul.mubr.msk.f32.gmra.mxu0 %vm1379_vm2, %v1370_v31 }
  0x71   : > { %3389 = vmatmul.mubr.msk.bf16.gmra.mxu1 %vm562_vm1, %v3595_v21  ;;  %3430 = vmatprep.mubr.msk.f32.mxu0 %vm1379_vm2, %v1371_v35 }
  0x74   : > { %3431 = vmatmul.mubr.msk.f32.gmra.mxu0 %vm1379_vm2, %v1372_v40 }
  0x75   : > { %3433 = vmatprep.mubr.msk.f32.mxu0 %vm1379_vm2, %v1373_v43 }
  0x78   : > { %3434 = vmatmul.mubr.msk.f32.gmra.mxu0 %vm1379_vm2, %v1374_v48 }
  0x79   : > { %3436 = vmatprep.mubr.msk.f32.mxu0 %vm1379_vm2, %v1375_v51 }
  0x7c   : > { %3437 = vmatmul.mubr.msk.f32.gmra.mxu0 %vm1379_vm2, %v1376_v55 }
  0x7d   : > { %3439 = vmatprep.mubr.msk.f32.mxu0 %vm1379_vm2, %v1377_v57 }
  0x80   : > { %3440 = vmatmul.mubr.msk.f32.gmra.mxu0 %vm1379_vm2, %v1378_v59 }
  0xf8   : > { %v4068_v60 = vpop.f32.mrf.mxu0 }
  0xfa   : > { %v4070_v61 = vpop.f32.mrf.mxu0 }
  0xfc   : > { %v4072_v62 = vpop.f32.mrf.mxu0 }
  0xfe   : > { %v4074_v63 = vpop.f32.mrf.mxu0 }
 0x104   : > { %v3396_v1 = vpop.f32.mrf.mxu0 }
 0x105   : > { %v1708_v3 = vmul.f32 %v3396_v1, %v4079_v0 }
 0x106   : > { %v1542_v4 = vpop.f32.mrf.mxu0 }
 0x107   : > { %v1707_v5 = vmul.f32 %v4079_v0, %v1542_v4  ;;  %v1746_v6 = vadd.f32 %v4084_v2, %v1708_v3 }
 0x108   : > { %v3399_v7 = vpop.f32.mrf.mxu0 }
 0x109   : > { %v1745_v8 = vadd.f32 %v4084_v2, %v1707_v5  ;;  %v1710_v9 = vmul.f32 %v3399_v7, %v4079_v0  ;;  %v1778_v14 = vmax.f32 %v1746_v6, 0.0 }
 0x10a   : > { %v1552_v10 = vpop.f32.mrf.mxu0 }
 0x10b   : > { %v1777_v11 = vmax.f32 %v1745_v8, 0.0  ;;  %v1709_v13 = vmul.f32 %v4079_v0, %v1552_v10  ;;  %v1748_v15 = vadd.f32 %v4084_v2, %v1710_v9 }
 0x10c   : > { %v3402_v16 = vpop.f32.mrf.mxu0 }
 0x10d   : > { %v1747_v17 = vadd.f32 %v4084_v2, %v1709_v13  ;;  %v1712_v19 = vmul.f32 %v3402_v16, %v4079_v0  ;;  %3444 = vmatprep.mubr.msk.f32.mxu0 %vm1379_vm2, %v1777_v11  ;;  %v1780_v24 = vmax.f32 %v1748_v15, 0.0 }
 0x10e   : > { %v1562_v21 = vpop.f32.mrf.mxu0  ;;  %3445 = vmatmul.mubr.msk.f32.vlgmr.msra.gmra.mxu0 %vm1379_vm2, %v1778_v14 }
 0x10f   : > { %v1779_v22 = vmax.f32 %v1747_v17, 0.0  ;;  %v1711_v23 = vmul.f32 %v4079_v0, %v1562_v21  ;;  %v1750_v25 = vadd.f32 %v4084_v2, %v1712_v19 }
 0x110   : > { %v3405_v26 = vpop.f32.mrf.mxu0 }
 0x111   : > { %v1749_v27 = vadd.f32 %v4084_v2, %v1711_v23  ;;  %v1714_v28 = vmul.f32 %v3405_v26, %v4079_v0  ;;  %3447 = vmatprep.mubr.msk.f32.mxu0 %vm1379_vm2, %v1779_v22  ;;  %v1782_v32 = vmax.f32 %v1750_v25, 0.0 }
 0x112   : > { %v1572_v29 = vpop.f32.mrf.mxu0  ;;  %3448 = vmatmul.mubr.msk.f32.gmra.mxu0 %vm1379_vm2, %v1780_v24 }
 0x113   : > { %v1781_v30 = vmax.f32 %v1749_v27, 0.0  ;;  %v1713_v31 = vmul.f32 %v4079_v0, %v1572_v29  ;;  %v1752_v33 = vadd.f32 %v4084_v2, %v1714_v28 }
 0x114   : > { %v3408_v34 = vpop.f32.mrf.mxu0 }
 0x115   : > { %v1751_v35 = vadd.f32 %v4084_v2, %v1713_v31  ;;  %v1716_v36 = vmul.f32 %v3408_v34, %v4079_v0  ;;  %3450 = vmatprep.mubr.msk.f32.mxu0 %vm1379_vm2, %v1781_v30  ;;  %v1784_v40 = vmax.f32 %v1752_v33, 0.0 }
 0x116   : > { %v1582_v37 = vpop.f32.mrf.mxu0  ;;  %3451 = vmatmul.mubr.msk.f32.gmra.mxu0 %vm1379_vm2, %v1782_v32 }
 0x117   : > { %v1783_v38 = vmax.f32 %v1751_v35, 0.0  ;;  %v1715_v39 = vmul.f32 %v4079_v0, %v1582_v37  ;;  %v1754_v41 = vadd.f32 %v4084_v2, %v1716_v36 }
 0x118   : > { %v3411_v42 = vpop.f32.mrf.mxu0 }
 0x119   : > { %v1753_v43 = vadd.f32 %v4084_v2, %v1715_v39  ;;  %v1718_v44 = vmul.f32 %v3411_v42, %v4079_v0  ;;  %3453 = vmatprep.mubr.msk.f32.mxu0 %vm1379_vm2, %v1783_v38  ;;  %v1786_v48 = vmax.f32 %v1754_v41, 0.0 }
 0x11a   : > { %v1592_v45 = vpop.f32.mrf.mxu0  ;;  %3454 = vmatmul.mubr.msk.f32.gmra.mxu0 %vm1379_vm2, %v1784_v40 }
 0x11b   : > { %v1785_v46 = vmax.f32 %v1753_v43, 0.0  ;;  %v1717_v47 = vmul.f32 %v4079_v0, %v1592_v45  ;;  %v1756_v49 = vadd.f32 %v4084_v2, %v1718_v44 }
 0x11c   : > { %v3414_v50 = vpop.f32.mrf.mxu0 }
 0x11d   : > { %v1755_v51 = vadd.f32 %v4084_v2, %v1717_v47  ;;  %v1720_v52 = vmul.f32 %v3414_v50, %v4079_v0  ;;  %3456 = vmatprep.mubr.msk.f32.mxu0 %vm1379_vm2, %v1785_v46  ;;  %v1788_v56 = vmax.f32 %v1756_v49, 0.0 }
 0x11e   : > { %v1602_v53 = vpop.f32.mrf.mxu0  ;;  %3457 = vmatmul.mubr.msk.f32.gmra.mxu0 %vm1379_vm2, %v1786_v48 }
 0x11f   : > { %v1787_v54 = vmax.f32 %v1755_v51, 0.0  ;;  %v1719_v55 = vmul.f32 %v4079_v0, %v1602_v53  ;;  %v1758_v57 = vadd.f32 %v4084_v2, %v1720_v52 }
 0x120   : > { %v3417_v58 = vpop.f32.mrf.mxu0 }
 0x121   : > { %v1757_v59 = vadd.f32 %v4084_v2, %v1719_v55  ;;  %v1722_v1 = vmul.f32 %v3417_v58, %v4079_v0  ;;  %3459 = vmatprep.mubr.msk.f32.mxu0 %vm1379_vm2, %v1787_v54  ;;  %v1790_v6 = vmax.f32 %v1758_v57, 0.0 }
 0x122   : > { %v1612_v3 = vpop.f32.mrf.mxu0  ;;  %3460 = vmatmul.mubr.msk.f32.gmra.mxu0 %vm1379_vm2, %v1788_v56 }
 0x123   : > { %v1789_v4 = vmax.f32 %v1757_v59, 0.0  ;;  %v1721_v5 = vmul.f32 %v4079_v0, %v1612_v3  ;;  %v1760_v7 = vadd.f32 %v4084_v2, %v1722_v1 }
 0x124   : > { %v3420_v8 = vpop.f32.mrf.mxu0 }
 0x125   : > { %v1759_v9 = vadd.f32 %v4084_v2, %v1721_v5  ;;  %v1724_v10 = vmul.f32 %v3420_v8, %v4079_v0  ;;  %3462 = vmatprep.mubr.msk.f32.mxu0 %vm1379_vm2, %v1789_v4  ;;  %v1792_v15 = vmax.f32 %v1760_v7, 0.0 }
 0x126   : > { %v1622_v11 = vpop.f32.mrf.mxu0  ;;  %3463 = vmatmul.mubr.msk.f32.gmra.mxu0 %vm1379_vm2, %v1790_v6 }
 0x127   : > { %v1791_v13 = vmax.f32 %v1759_v9, 0.0  ;;  %v1723_v14 = vmul.f32 %v4079_v0, %v1622_v11  ;;  %v1762_v16 = vadd.f32 %v4084_v2, %v1724_v10 }
 0x128   : > { %v3423_v17 = vpop.f32.mrf.mxu0 }
 0x129   : > { %v1761_v19 = vadd.f32 %v4084_v2, %v1723_v14  ;;  %v1726_v21 = vmul.f32 %v3423_v17, %v4079_v0  ;;  %3465 = vmatprep.mubr.msk.f32.mxu1 %vm1379_vm2, %v1791_v13  ;;  %v1794_v25 = vmax.f32 %v1762_v16, 0.0 }
 0x12a   : > { %v1632_v22 = vpop.f32.mrf.mxu0  ;;  %3466 = vmatmul.mubr.msk.f32.vlgmr.msra.gmra.mxu1 %vm1379_vm2, %v1792_v15 }
 0x12b   : > { %v1793_v23 = vmax.f32 %v1761_v19, 0.0  ;;  %v1725_v24 = vmul.f32 %v4079_v0, %v1632_v22  ;;  %v1764_v26 = vadd.f32 %v4084_v2, %v1726_v21 }
 0x12c   : > { %v3426_v27 = vpop.f32.mrf.mxu0 }
 0x12d   : > { %v1763_v28 = vadd.f32 %v4084_v2, %v1725_v24  ;;  %v1728_v29 = vmul.f32 %v3426_v27, %v4079_v0  ;;  %3468 = vmatprep.mubr.msk.f32.mxu1 %vm1379_vm2, %v1793_v23  ;;  %v1796_v33 = vmax.f32 %v1764_v26, 0.0  ;;  %v4182_v23 = vpop.f32.mrf.mxu1 }
 0x12e   : > { %v1642_v30 = vpop.f32.mrf.mxu0  ;;  %3469 = vmatmul.mubr.msk.f32.gmra.mxu1 %vm1379_vm2, %v1794_v25 }
 0x12f   : > { %v1795_v31 = vmax.f32 %v1763_v28, 0.0  ;;  %v1727_v32 = vmul.f32 %v4079_v0, %v1642_v30  ;;  %v1766_v34 = vadd.f32 %v4084_v2, %v1728_v29  ;;  %v4184_v24 = vpop.f32.mrf.mxu1 }
 0x130   : > { %v3429_v35 = vpop.f32.mrf.mxu0 }
 0x131   : > { %v1765_v36 = vadd.f32 %v4084_v2, %v1727_v32  ;;  %v1730_v37 = vmul.f32 %v3429_v35, %v4079_v0  ;;  %3471 = vmatprep.mubr.msk.f32.mxu1 %vm1379_vm2, %v1795_v31  ;;  %v1798_v41 = vmax.f32 %v1766_v34, 0.0 }
 0x132   : > { %v1652_v38 = vpop.f32.mrf.mxu0  ;;  %3472 = vmatmul.mubr.msk.f32.gmra.mxu1 %vm1379_vm2, %v1796_v33 }
 0x133   : > { %v1797_v39 = vmax.f32 %v1765_v36, 0.0  ;;  %v1729_v40 = vmul.f32 %v4079_v0, %v1652_v38  ;;  %v1768_v42 = vadd.f32 %v4084_v2, %v1730_v37 }
 0x134   : > { %v3432_v43 = vpop.f32.mrf.mxu0 }
 0x135   : > { %v1767_v44 = vadd.f32 %v4084_v2, %v1729_v40  ;;  %v1732_v45 = vmul.f32 %v3432_v43, %v4079_v0  ;;  %3474 = vmatprep.mubr.msk.f32.mxu1 %vm1379_vm2, %v1797_v39  ;;  %v1800_v49 = vmax.f32 %v1768_v42, 0.0  ;;  %v2141_v43 = vrot.slane %v4070_v61, %v3913_v18 }
 0x136   : > { %v1662_v46 = vpop.f32.mrf.mxu0  ;;  %3475 = vmatmul.mubr.msk.f32.gmra.mxu1 %vm1379_vm2, %v1798_v41 }
 0x137   : > { %v1799_v47 = vmax.f32 %v1767_v44, 0.0  ;;  %v1731_v48 = vmul.f32 %v4079_v0, %v1662_v46  ;;  %v1770_v50 = vadd.f32 %v4084_v2, %v1732_v45  ;;  %v2134_v44 = vcombine.high %v4070_v61, %v4070_v61 }
 0x138   : > { %v3435_v51 = vpop.f32.mrf.mxu0  ;;  %v2149_v46 = vcombine.high %v2141_v43, %v2141_v43 }
 0x139   : > { %v1769_v52 = vadd.f32 %v4084_v2, %v1731_v48  ;;  %v1734_v53 = vmul.f32 %v3435_v51, %v4079_v0  ;;  %3477 = vmatprep.mubr.msk.f32.mxu1 %vm1379_vm2, %v1799_v47  ;;  %v1802_v57 = vmax.f32 %v1770_v50, 0.0  ;;  %v2232_v47 = vcombine.high %v4068_v60, %v4068_v60 }
 0x13a   : > { %v1672_v54 = vpop.f32.mrf.mxu0  ;;  %3478 = vmatmul.mubr.msk.f32.gmra.mxu1 %vm1379_vm2, %v1800_v49  ;;  %v2148_v48 = vrot.slane %v2134_v44, %v3913_v18  ;;  %v2190_v49 = vrot.slane %v4074_v63, %v3913_v18  ;;  %v2239_v51 = vrot.slane %v4068_v60, %v3913_v18  ;;  %v2171_v61 = vrot.slane %v2149_v46, %v3913_v18 }
 0x13b   : > { %v1801_v55 = vmax.f32 %v1769_v52, 0.0  ;;  %v1733_v56 = vmul.f32 %v4079_v0, %v1672_v54  ;;  %v1772_v58 = vadd.f32 %v4084_v2, %v1734_v53  ;;  %v2183_v52 = vcombine.high %v4074_v63, %v4074_v63 }
 0x13c   : > { %v3438_v59 = vpop.f32.mrf.mxu0  ;;  %v2246_v53 = vrot.slane %v2232_v47, %v3913_v18  ;;  %v2150_v54 = vcombine.high %v2148_v48, %v2148_v48  ;;  %v2247_v60 = vcombine.high %v2239_v51, %v2239_v51  ;;  %v2288_v63 = vrot.slane %v4072_v62, %v3913_v18 }
 0x13d   : > { %v1771_v1 = vadd.f32 %v4084_v2, %v1733_v56  ;;  %v1736_v3 = vmul.f32 %v3438_v59, %v4079_v0  ;;  %3480 = vmatprep.mubr.msk.f32.mxu1 %vm1379_vm2, %v1801_v55  ;;  %v1804_v7 = vmax.f32 %v1772_v58, 0.0  ;;  %v2164_v55 = vrot.slane %v2148_v48, %v3913_v18 }
 0x13e   : > { %v1682_v4 = vpop.f32.mrf.mxu0  ;;  %3481 = vmatmul.mubr.msk.f32.gmra.mxu1 %vm1379_vm2, %v1802_v57  ;;  %v4247_v56 = vrot.slane %v2141_v43, %v3913_v18  ;;  %v2281_v57 = vcombine.high %v4072_v62, %v4072_v62  ;;  %v2198_v58 = vcombine.high %v2190_v49, %v2190_v49  ;;  %v4284_v44 = vrot.slane %v2288_v63, %v3913_v18 }
 0x13f   : > { %v1803_v5 = vmax.f32 %v1771_v1, 0.0  ;;  %v1735_v6 = vmul.f32 %v4079_v0, %v1682_v4  ;;  %v1774_v8 = vadd.f32 %v4084_v2, %v1736_v3  ;;  %v2197_v1 = vrot.slane %v2183_v52, %v3913_v18 }
 0x140   : > { %v3441_v9 = vpop.f32.mrf.mxu0  ;;  %v4257_v3 = vrot.slane %v2239_v51, %v3913_v18  ;;  %v2181_v4 = vcombine.high %v2171_v61, %v2171_v61  ;;  %v2295_v62 = vrot.slane %v2281_v57, %v3913_v18  ;;  %v2349_v43 = vrot.slane %v2164_v55, %v3918_v20 }
 0x141   : > { %v1773_v10 = vadd.f32 %v4084_v2, %v1735_v6  ;;  %v1738_v11 = vmul.f32 %v3441_v9, %v4079_v0  ;;  %3483 = vmatprep.mubr.msk.f32.mxu1 %vm1379_vm2, %v1803_v5  ;;  %v1806_v16 = vmax.f32 %v1774_v8, 0.0  ;;  %v2248_v5 = vcombine.high %v2246_v53, %v2246_v53 }
 0x142   : > { %v1692_v13 = vpop.f32.mrf.mxu0  ;;  %3484 = vmatmul.mubr.msk.f32.gmra.mxu1 %vm1379_vm2, %v1804_v7  ;;  %v2206_v6 = vrot.slane %v2190_v49, %v3913_v18  ;;  %v2180_v7 = vcombine.high %v2164_v55, %v2164_v55  ;;  %v2178_v8 = vrot.slane %v2150_v54, %v3913_v18  ;;  %v4262_v9 = vrot.slane %v2246_v53, %v3913_v18 }
 0x143   : > { %v1805_v14 = vmax.f32 %v1773_v10, 0.0  ;;  %v1737_v15 = vmul.f32 %v4079_v0, %v1692_v13  ;;  %v1776_v17 = vadd.f32 %v4084_v2, %v1738_v11  ;;  %v4186_v0 = vpop.f32.mrf.mxu1  ;;  %v2333_v10 = vrot.slane %v4247_v56, %v3918_v20 }
 0x144   : > { %v2220_v11 = vrot.slane %v2198_v58, %v3913_v18  ;;  %v4287_v46 = vrot.slane %v2180_v7, %v3918_v20  ;;  %v2182_v47 = vcombine.high %v2178_v8, %v2178_v8  ;;  %v2228_v48 = vcombine.high %v2206_v6, %v2206_v6 }
 0x145   : > { %v1775_v19 = vadd.f32 %v4084_v2, %v1737_v15  ;;  %3486 = vmatprep.mubr.msk.f32.mxu1 %vm1379_vm2, %v1805_v14  ;;  %v1808_v22 = vmax.f32 %v1776_v17, 0.0  ;;  %v4188_v25 = vpop.f32.mrf.mxu1  ;;  %v4271_v14 = vrot.slane %v2247_v60, %v3913_v18  ;;  %v2179_v15 = vcombine.high %v4247_v56, %v4247_v56 }
 0x146   : > { %3487 = vmatmul.mubr.msk.f32.gmra.mxu1 %vm1379_vm2, %v1806_v16  ;;  %v2296_v16 = vcombine.high %v2288_v63, %v2288_v63  ;;  %v2199_v17 = vcombine.high %v2197_v1, %v2197_v1  ;;  %v4290_v49 = vsub.f32 %v2333_v10, %v4184_v24  ;;  %v2297_v51 = vcombine.high %v2295_v62, %v2295_v62 }
 0x147   : > { %v1807_v21 = vmax.f32 %v1775_v19, 0.0  ;;  %v4190_v26 = vpop.f32.mrf.mxu1  ;;  %v4276_v19 = vrot.slane %v2181_v4, %v3918_v20  ;;  %v2353_v52 = vrot.slane %v2178_v8, %v3918_v20  ;;  %v2230_v53 = vcombine.high %v2220_v11, %v2220_v11 }
 0x148   : > { %v4299_v55 = vrot.slane %v2296_v16, %v3913_v18  ;;  %v2365_v56 = vrot.slane %v2206_v6, %v3918_v20  ;;  %v2227_v57 = vrot.slane %v2199_v17, %v3913_v18  ;;  %v4316_v4 = vrot.slane %v2182_v47, %v3918_v20 }
 0x149   : > { %3489 = vmatprep.mubr.msk.f32.mxu1 %vm1379_vm2, %v1807_v21  ;;  %v4192_v2 = vpop.f32.mrf.mxu1  ;;  %v4279_v21 = vrot.slane %v2197_v1, %v3913_v18  ;;  %v4319_v6 = vrot.slane %v2228_v48, %v3918_v20  ;;  %v2369_v8 = vrot.slane %v2220_v11, %v3918_v20  ;;  %v2397_v11 = vrot.slane %v4257_v3, %v3918_v20 }
 0x14a   : > { %3490 = vmatmul.mubr.msk.f32.gmra.mxu1 %vm1379_vm2, %v1808_v22  ;;  %v2337_v22 = vrot.slane %v2171_v61, %v3918_v20  ;;  %v4296_v61 = vrot.slane %v2295_v62, %v3913_v18  ;;  %v4309_v60 = vsub.f32 %v2349_v43, %v4192_v2  ;;  %v4327_v2 = vrot.slane %v2230_v53, %v3918_v20 }
 0x14b   : > { %v4194_v27 = vpop.f32.mrf.mxu1  ;;  %v2229_v63 = vcombine.high %v4279_v21, %v4279_v21  ;;  %4872 = vst [vmem:[#allocation26_spill] sm:$0xff] %v4319_v6  ;;  %v2381_v10 = vrot.slane %v4279_v21, %v3918_v20  ;;  %v2231_v17 = vcombine.high %v2227_v57, %v2227_v57  ;;  %v2278_v21 = vcombine.high %v4262_v9, %v4262_v9 }
 0x14c   : > { %v4306_v58 = vsub.f32 %v2337_v22, %v4188_v25  ;;  %v2277_v25 = vcombine.high %v4257_v3, %v4257_v3  ;;  %v2279_v22 = vcombine.high %v4271_v14, %v4271_v14  ;;  %v4347_v47 = vstv %s3861_s22  ;;  %s4920_s22 = sld [smem:[#allocation11_spill]] }
 0x14d   : > { %v4196_v28 = vpop.f32.mrf.mxu1  ;;  %v4340_v43 = vrot.slane %v2229_v63, %v3918_v20  ;;  %v2385_v53 = vrot.slane %v2227_v57, %v3918_v20  ;;  %v2401_v63 = vrot.slane %v4271_v14, %v3918_v20  ;;  %v2326_v3 = vcombine.high %v4284_v44, %v4284_v44 }
 0x14e   : > { %v4324_v7 = vsub.f32 %v2353_v52, %v4196_v28  ;;  %v2276_v28 = vrot.slane %v2248_v5, %v3913_v18  ;;  %v4356_v5 = vrot.slane %v2277_v25, %v3918_v20  ;;  %v2328_v16 = vcombine.high %v4299_v55, %v4299_v55 }
 0x14f   : > { %v4198_v29 = vpop.f32.mrf.mxu1  ;;  %v4367_v48 = vrot.slane %v2297_v51, %v3913_v18  ;;  %v2563_v14 = vadd.s32 %v4347_v47, %v3907_v12  ;;  %v4380_v24 = vrot.slane %v2278_v21, %v3918_v20  ;;  %v2413_v18 = vrot.slane %v4262_v9, %v3918_v20 }
 0x150   : > { %4867 = vst [vmem:[#allocation21_spill] sm:$0xff] %v4198_v29  ;;  %v2280_v57 = vcombine.high %v2276_v28, %v2276_v28  ;;  %v2327_v51 = vcombine.high %v4296_v61, %v4296_v61  ;;  %v4393_v29 = vrot.slane %v2179_v15, %v3918_v20  ;;  %v4398_v25 = vrot.slane %v2326_v3, %v3918_v20 }
 0x151   : > { %v4200_v30 = vpop.f32.mrf.mxu1  ;;  %4874 = vst [vmem:[#allocation28_spill] sm:$0xff] %v4380_v24  ;;  %v4401_v9 = vrot.slane %v2328_v16, %v3918_v20  ;;  %vm2567_vm3 = vcmp.lt.s32.totalorder %v2563_v14, 126  ;;  %v2559_v15 = vadd.s32 8, %v3907_v12  ;;  %v2445_v16 = vrot.slane %v4296_v61, %v3918_v20 }
 0x152   : > { %v4352_v52 = vsub.f32 %v2365_v56, %v4200_v30  ;;  %v4370_v30 = vrot.slane %v2231_v17, %v3918_v20  ;;  %v4373_v56 = vrot.slane %v2279_v22, %v3918_v20  ;;  %v2417_v22 = vrot.slane %v2276_v28, %v3918_v20  ;;  %4875 = vst [vmem:[#allocation29_spill] sm:$0xff] %v4398_v25  ;;  %s3262_s12 = sshll.u32 %s4920_s22, 7  ;;  %s3603_s22 = scalar_lea.vmem %s3602_s15, 256 }
 0x153   : > { %v4202_v31 = vpop.f32.mrf.mxu1  ;;  %4876 = vst [vmem:[#allocation30_spill] sm:$0xff] %v4401_v9  ;;  %v2433_v28 = vrot.slane %v4299_v55, %v3918_v20  ;;  %v4415_v3 = vrot.slane %v2327_v51, %v3918_v20  ;;  %v4424_v14 = vsub.s32 1, %v3907_v12  ;;  %v4838_v21 = vmov 0.0   ;;  %s4723_s24 = scalar_lea.hbm %s4923_s18, %s3262_s12  ;;  %s4732_s29 = scalar_lea.hbm %s4925_s11, %s3262_s12 }
 0x154   : > { %v4886_v9 = vmov 0.0   ;;  %p3605_p6 = scmp.lt.s32.totalorder %s3603_s22, %s3597_s30 }
 0x155   : > { %v4204_v32 = vpop.f32.mrf.mxu1  ;;  %4878 = vst [vmem:[#allocation32_spill] sm:$0xff] %v4415_v3 }
 0x156   : > { %v4387_v17 = vsub.f32 %v2369_v8, %v4204_v32  ;;  %v2329_v32 = vcombine.high %v4367_v48, %v4367_v48  ;;  %v4406_v8 = vrot.slane %v2280_v57, %v3918_v20  ;;  %v2449_v57 = vrot.slane %v4367_v48, %v3918_v20  ;;  %p3606_p7 = por %p3605_p6, %p3604_p5 }
 0x157   : > { %v4206_v33 = vpop.f32.mrf.mxu1  ;;  %v4439_v48 = vsel %vm2567_vm3, 1.0, %v4838_v21 }
 0x158   : > { %4877 = vst [vmem:[#allocation31_spill] sm:$0xff] %v4406_v8  ;;  %v4436_v61 = vrot.slane %v2329_v32, %v3918_v20  ;;  %p3607_p8 = pnand %p3606_p7, %p3600_p4 }
 0x159   : > { %v4208_v34 = vpop.f32.mrf.mxu1 }
 0x15a   : > { %4880 = vst [vmem:[#allocation34_spill] sm:$0xff] %v4436_v61 }
 0x15b   : > { %v4210_v35 = vpop.f32.mrf.mxu1 }
 0x15d   : > { %v4212_v36 = vpop.f32.mrf.mxu1 }
 0x15e   : > { %v4429_v55 = vsub.f32 %v2385_v53, %v4212_v36  ;;  %v2564_v36 = vadd.s32 %v4347_v47, %v2559_v15 }
 0x15f   : > { %v4214_v37 = vpop.f32.mrf.mxu1 }
 0x160   : > { %vm2568_vm4 = vcmp.lt.s32.totalorder %v2564_v36, 126 }
 0x161   : > { %v4216_v38 = vpop.f32.mrf.mxu1 }
 0x162   : > { %v4442_v3 = vsub.f32 %v2397_v11, %v4216_v38  ;;  %v4458_v38 = vsub.s32 3, %v3907_v12 }
 0x163   : > { %v4218_v39 = vpop.f32.mrf.mxu1 }
 0x165   : > { %v4220_v40 = vpop.f32.mrf.mxu1 }
 0x167   : > { %v4222_v41 = vpop.f32.mrf.mxu1 }
 0x168   : > { %4868 = vst [vmem:[#allocation22_spill] sm:$0xff] %v4222_v41 }
 0x169   : > { %v4224_v42 = vpop.f32.mrf.mxu1 }
 0x16a   : > { %v4453_v32 = vsub.f32 %v2413_v18, %v4224_v42  ;;  %v2590_v42 = vrot.slane %v4439_v48, %v4424_v14 }
 0x16b   : > { %v4230_v45 = vpop.f32.mrf.mxu1 }
 0x16c   : > { %4869 = vst [vmem:[#allocation23_spill] sm:$0xff] %v4230_v45 }
 0x16d   : > { %v4237_v50 = vpop.f32.mrf.mxu1 }
 0x16e   : > { %v4461_v11 = vsub.f32 %v2417_v22, %v4237_v50  ;;  %v2586_v22 = vrot.slane %v4439_v48, %v3918_v20 }
 0x16f   : > { %v4251_v59 = vpop.f32.mrf.mxu1 }
 0x170   : > { %4870 = vst [vmem:[#allocation24_spill] sm:$0xff] %v4251_v59 }
 0x171   : > { %v4268_v13 = vpop.f32.mrf.mxu1 }
 0x173   : > { %v4293_v54 = vpop.f32.mrf.mxu1 }
 0x174   : > { %4871 = vst [vmem:[#allocation25_spill] sm:$0xff] %v4293_v54 }
 0x175   : > { %v4332_v62 = vpop.f32.mrf.mxu1 }
 0x176   : > { %v4473_v53 = vsub.f32 %v2433_v28, %v4332_v62  ;;  %v2598_v28 = vrot.slane %v4439_v48, %v4458_v38 }
 0x177   : > { %v4364_v1 = vpop.f32.mrf.mxu1 }
 0x178   : > { %4873 = vst [vmem:[#allocation27_spill] sm:$0xff] %v4364_v1  ;;  %v2429_v1 = vrot.slane %v4284_v44, %v3918_v20  ;;  %v4410_v44 = vsub.f32 %v2381_v10, %v4208_v34  ;;  %v2492_v34 = vsub.f32 %v4393_v29, %v4182_v23  ;;  %v4447_v29 = vsub.f32 %v2401_v63, %v4220_v40 }
 0x179   : > { %v932_v6 = vpop.f32.mrf.mxu1  ;;  %4882 = vst [vmem:[#allocation36_spill] sm:$0xff] %v4473_v53  ;;  %v4485_v23 = vsub.s32 4, %v3907_v12 }
 0x17a   : > { %v4466_v63 = vsub.f32 %v2429_v1, %v4268_v13  ;;  %v4479_v13 = vsub.s32 2, %v3907_v12  ;;  %v4482_v1 = vsub.s32 5, %v3907_v12  ;;  %v4496_v18 = vsub.f32 %v2445_v16, %v932_v6 }
 0x17b   : > { %v4433_v51 = vpop.f32.mrf.mxu1 }
 0x17c   : > { %4879 = vst [vmem:[#allocation33_spill] sm:$0xff] %v4433_v51  ;;  %4881 = vst [vmem:[#allocation35_spill] sm:$0xff] %v4466_v63  ;;  %v4506_v63 = vsel %vm2568_vm4, 1.0, %v4886_v9  ;;  %v2594_v6 = vrot.slane %v4439_v48, %v4479_v13  ;;  %v2606_v16 = vrot.slane %v4439_v48, %v4482_v1 }
 0x17d   : > { %v935_v10 = vpop.f32.mrf.mxu1  ;;  %4883 = vst [vmem:[#allocation37_spill] sm:$0xff] %v4496_v18  ;;  %v2622_v21 = vrot.slane %v4506_v63, %v4424_v14  ;;  %v2618_v61 = vrot.slane %v4506_v63, %v3918_v20 }
 0x17e   : > { %v4500_v59 = vsub.f32 %v2449_v57, %v935_v10  ;;  %v2602_v57 = vrot.slane %v4439_v48, %v4485_v23  ;;  %v2560_v10 = vadd.s32 16, %v3907_v12 }
 0x180   : > { %4884 = vst [vmem:[#allocation38_spill] sm:$0xff] %v4500_v59  ;;  %v2565_v18 = vadd.s32 %v4347_v47, %v2560_v10  ;;  %v2634_v10 = vrot.slane %v4506_v63, %v4485_v23 }
 0x182   : > { %vm2569_vm6 = vcmp.lt.s32.totalorder %v2565_v18, 126 }
 0x1ce   : > { %v3446_v15 = vpop.f32.mrf.mxu0 }
 0x1cf   : > { %v2523_v50 = vadd.f32 %v3446_v15, %v4306_v58  ;;  %v4491_v58 = vsub.s32 7, %v3907_v12  ;;  %v4494_v15 = vsub.s32 6, %v3907_v12 }
 0x1d0   : > { %v1971_v40 = vpop.f32.mrf.mxu0 }
 0x1d1   : > { %v2522_v62 = vadd.f32 %v4290_v49, %v1971_v40  ;;  %v2744_v25 = vmul.f32 %v2590_v42, %v2523_v50  ;;  %v4885_v40 = vsub.f32 %v4276_v19, %v4186_v0  ;;  %v2614_v0 = vrot.slane %v4439_v48, %v4491_v58 }
 0x1d2   : > { %v3449_v36 = vpop.f32.mrf.mxu0  ;;  %v2610_v19 = vrot.slane %v4439_v48, %v4494_v15 }
 0x1d3   : > { %v2743_v49 = vmul.f32 %v2586_v22, %v2522_v62  ;;  %v2525_v54 = vadd.f32 %v3449_v36, %v4885_v40  ;;  %v2850_v22 = vmul.f32 %v2744_v25, %v2744_v25  ;;  %v2778_v48 = vsel %vm2776_vm5, %v2744_v25, 0.0 }
 0x1d4   : > { %v1981_v53 = vpop.f32.mrf.mxu0 }
 0x1d5   : > { %v2849_v42 = vmul.f32 %v2743_v49, %v2743_v49  ;;  %v2746_v50 = vmul.f32 %v2598_v28, %v2525_v54  ;;  %v2777_v62 = vsel %vm2776_vm5, %v2743_v49, 0.0  ;;  %v2524_v36 = vadd.f32 %v2492_v34, %v1981_v53 }
 0x1d6   : > { %v3452_v40 = vpop.f32.mrf.mxu0  ;;  %v2779_v59 = vadd.f32 %v2778_v48, %v2777_v62  ;;  %v2882_v54 = vsel %vm2776_vm5, %v2850_v22, 0.0 }
 0x1d7   : > { %v2527_v51 = vadd.f32 %v3452_v40, %v4324_v7  ;;  %v2881_v49 = vsel %vm2776_vm5, %v2849_v42, 0.0  ;;  %v2745_v34 = vmul.f32 %v2594_v6, %v2524_v36  ;;  %v2852_v41 = vmul.f32 %v2746_v50, %v2746_v50 }
 0x1d8   : > { %v1991_v53 = vpop.f32.mrf.mxu0  ;;  %v2638_v40 = vrot.slane %v4506_v63, %v4482_v1  ;;  %v2883_v8 = vadd.f32 %v2882_v54, %v2881_v49  ;;  %v2782_v62 = vsel %vm2776_vm5, %v2746_v50, 0.0  ;;  %v4887_v36 = vsub.f32 %v4316_v4, %v4194_v27 }
 0x1d9   : > { %v2526_v7 = vadd.f32 %v4309_v60, %v1991_v53  ;;  %v2780_v24 = vsel %vm2776_vm5, %v2745_v34, 0.0  ;;  %v2851_v28 = vmul.f32 %v2745_v34, %v2745_v34  ;;  %v2748_v45 = vmul.f32 %v2606_v16, %v2527_v51 }
 0x1da   : > { %v3455_v25 = vpop.f32.mrf.mxu0  ;;  %v2781_v42 = vadd.f32 %v2780_v24, %v2779_v59  ;;  %v2886_v34 = vsel %vm2776_vm5, %v2852_v41, 0.0  ;;  %v4888_v50 = vsub.f32 %v4287_v46, %v4190_v26  ;;  %v2646_v4 = vrot.slane %v4506_v63, %v4491_v58 }
 0x1db   : > { %v2747_v6 = vmul.f32 %v2602_v57, %v2526_v7  ;;  %v2884_v60 = vsel %vm2776_vm5, %v2851_v28, 0.0  ;;  %v2529_v48 = vadd.f32 %v3455_v25, %v4887_v36  ;;  %v2854_v24 = vmul.f32 %v2748_v45, %v2748_v45 }
 0x1dc   : > { %v2001_v22 = vpop.f32.mrf.mxu0  ;;  %v2885_v51 = vadd.f32 %v2884_v60, %v2883_v8  ;;  %v2783_v16 = vadd.f32 %v2782_v62, %v2781_v42  ;;  %v2786_v41 = vsel %vm2776_vm5, %v2748_v45, 0.0 }
 0x1dd   : > { %v2784_v59 = vsel %vm2776_vm5, %v2747_v6, 0.0  ;;  %v2853_v57 = vmul.f32 %v2747_v6, %v2747_v6  ;;  %v2750_v54 = vmul.f32 %v2614_v0, %v2529_v48  ;;  %v2528_v49 = vadd.f32 %v4888_v50, %v2001_v22 }
 0x1de   : > { %v3458_v28 = vpop.f32.mrf.mxu0  ;;  %v2785_v53 = vadd.f32 %v2784_v59, %v2783_v16  ;;  %v2887_v7 = vadd.f32 %v2886_v34, %v2885_v51  ;;  %v4556_v0 = vsel %vm2569_vm6, 1.0, %v4886_v9  ;;  %v4889_v59 = vsub.f32 %v4327_v2, %v4202_v31 }
 0x1df   : > { %v2531_v27 = vadd.f32 %v3458_v28, %v4387_v17  ;;  %v2888_v8 = vsel %vm2776_vm5, %v2853_v57, 0.0  ;;  %v2749_v25 = vmul.f32 %v2610_v19, %v2528_v49  ;;  %v2856_v46 = vmul.f32 %v2750_v54, %v2750_v54  ;;  %v4890_v28 = vld [vmem:[#allocation26_spill] sm:$0xff] }
 0x1e0   : > { %v2011_v42 = vpop.f32.mrf.mxu0  ;;  %v2889_v26 = vadd.f32 %v2888_v8, %v2887_v7  ;;  %v2787_v6 = vadd.f32 %v2786_v41, %v2785_v53  ;;  %v2890_v17 = vsel %vm2776_vm5, %v2854_v24, 0.0  ;;  %v2642_v19 = vrot.slane %v4506_v63, %v4494_v15  ;;  %v4891_v53 = vld [vmem:[#allocation21_spill] sm:$0xff] }
 0x1e1   : > { %v2530_v62 = vadd.f32 %v4352_v52, %v2011_v42  ;;  %v2788_v60 = vsel %vm2776_vm5, %v2749_v25, 0.0  ;;  %v2855_v36 = vmul.f32 %v2749_v25, %v2749_v25  ;;  %v2752_v48 = vmul.f32 %v2622_v21, %v2531_v27 }
 0x1e2   : > { %v3461_v45 = vpop.f32.mrf.mxu0  ;;  %v2789_v22 = vadd.f32 %v2788_v60, %v2787_v6  ;;  %v2891_v34 = vadd.f32 %v2890_v17, %v2889_v26  ;;  %v2654_v18 = vrot.slane %v4556_v0, %v4424_v14  ;;  %v2790_v51 = vsel %vm2776_vm5, %v2750_v54, 0.0 }
 0x1e3   : > { %v2892_v16 = vsel %vm2776_vm5, %v2855_v36, 0.0  ;;  %v2751_v52 = vmul.f32 %v2618_v61, %v2530_v62  ;;  %v2533_v24 = vadd.f32 %v3461_v45, %v4889_v59  ;;  %v2894_v21 = vsel %vm2776_vm5, %v2856_v46, 0.0 }
 0x1e4   : > { %v2021_v57 = vpop.f32.mrf.mxu0  ;;  %v2893_v50 = vadd.f32 %v2892_v16, %v2891_v34  ;;  %v2791_v49 = vadd.f32 %v2790_v51, %v2789_v22  ;;  %v4892_v7 = vsub.f32 %v4890_v28, %v4891_v53  ;;  %v2858_v41 = vmul.f32 %v2752_v48, %v2752_v48 }
 0x1e5   : > { %v2792_v8 = vsel %vm2776_vm5, %v2751_v52, 0.0  ;;  %v2857_v54 = vmul.f32 %v2751_v52, %v2751_v52  ;;  %v4893_v61 = vrot.slane %v4506_v63, %v4458_v38  ;;  %v4894_v26 = vrot.slane %v4506_v63, %v4479_v13 }
 0x1e6   : > { %v2532_v27 = vadd.f32 %v4892_v7, %v2021_v57  ;;  %v3464_v42 = vpop.f32.mrf.mxu0  ;;  %v2793_v31 = vadd.f32 %v2792_v8, %v2791_v49  ;;  %v2895_v2 = vadd.f32 %v2894_v21, %v2893_v50  ;;  %v2794_v62 = vsel %vm2776_vm5, %v2752_v48, 0.0 }
 0x1e7   : > { %v2754_v25 = vmul.f32 %v4893_v61, %v2533_v24  ;;  %v2535_v6 = vadd.f32 %v3464_v42, %v4429_v55  ;;  %v2896_v17 = vsel %vm2776_vm5, %v2857_v54, 0.0  ;;  %v2650_v36 = vrot.slane %v4556_v0, %v3918_v20 }
 0x1e8   : > { %v2753_v46 = vmul.f32 %v4894_v26, %v2532_v27  ;;  %v2031_v60 = vpop.f32.mrf.mxu0  ;;  %v2561_v45 = vadd.s32 24, %v3907_v12  ;;  %v2897_v22 = vadd.f32 %v2896_v17, %v2895_v2  ;;  %v2795_v34 = vadd.f32 %v2794_v62, %v2793_v31 }
 0x1e9   : > { %v2898_v52 = vsel %vm2776_vm5, %v2858_v41, 0.0  ;;  %v2860_v59 = vmul.f32 %v2754_v25, %v2754_v25  ;;  %v2756_v55 = vmul.f32 %v2638_v40, %v2535_v6  ;;  %v2534_v48 = vadd.f32 %v4410_v44, %v2031_v60 }
 0x1ea   : > { %v2796_v51 = vsel %vm2776_vm5, %v2753_v46, 0.0  ;;  %v2859_v16 = vmul.f32 %v2753_v46, %v2753_v46  ;;  %v3467_v24 = vpop.f32.mrf.mxu1  ;;  %v2899_v21 = vadd.f32 %v2898_v52, %v2897_v22  ;;  %v4895_v12 = vsub.f32 %v4370_v30, %v4210_v35 }
 0x1eb   : > { %v2797_v57 = vadd.f32 %v2796_v51, %v2795_v34  ;;  %v2798_v28 = vsel %vm2776_vm5, %v2754_v25, 0.0  ;;  %v2755_v53 = vmul.f32 %v2634_v10, %v2534_v48  ;;  %v2662_v40 = vrot.slane %v4556_v0, %v4458_v38 }
 0x1ec   : > { %v2900_v50 = vsel %vm2776_vm5, %v2859_v16, 0.0  ;;  %v2537_v49 = vadd.f32 %v3467_v24, %v4895_v12  ;;  %v2041_v7 = vpop.f32.mrf.mxu1  ;;  %v2658_v44 = vrot.slane %v4556_v0, %v4479_v13  ;;  %v2862_v41 = vmul.f32 %v2756_v55, %v2756_v55 }
 0x1ed   : > { %v2901_v27 = vadd.f32 %v2900_v50, %v2899_v21  ;;  %v2799_v8 = vadd.f32 %v2798_v28, %v2797_v57  ;;  %v4896_v35 = vsub.f32 %v4340_v43, %v4206_v33  ;;  %v2902_v54 = vsel %vm2776_vm5, %v2860_v59, 0.0 }
 0x1ee   : > { %v2800_v61 = vsel %vm2776_vm5, %v2755_v53, 0.0  ;;  %v2861_v25 = vmul.f32 %v2755_v53, %v2755_v53  ;;  %v2758_v10 = vmul.f32 %v2646_v4, %v2537_v49  ;;  %v3470_v42 = vpop.f32.mrf.mxu1  ;;  %v2670_v26 = vrot.slane %v4556_v0, %v4482_v1 }
 0x1ef   : > { %v2536_v30 = vadd.f32 %v4896_v35, %v2041_v7  ;;  %v2801_v31 = vadd.f32 %v2800_v61, %v2799_v8  ;;  %v2903_v2 = vadd.f32 %v2902_v54, %v2901_v27  ;;  %v2566_v46 = vadd.s32 %v4347_v47, %v2561_v45 }
 0x1f0   : > { %v2802_v33 = vsel %vm2776_vm5, %v2756_v55, 0.0  ;;  %v2904_v43 = vsel %vm2776_vm5, %v2861_v25, 0.0  ;;  %v2539_v62 = vadd.f32 %v3470_v42, %v4447_v29  ;;  %v2051_v17 = vpop.f32.mrf.mxu1  ;;  %v2906_v60 = vsel %vm2776_vm5, %v2862_v41, 0.0 }
 0x1f1   : > { %v2757_v6 = vmul.f32 %v2642_v19, %v2536_v30  ;;  %v2905_v63 = vadd.f32 %v2904_v43, %v2903_v2  ;;  %v2803_v4 = vadd.f32 %v2802_v33, %v2801_v31  ;;  %v2538_v22 = vadd.f32 %v4442_v3, %v2051_v17  ;;  %v4899_v17 = vld [vmem:[#allocation31_spill] sm:$0xff] }
 0x1f2   : > { %v2864_v34 = vmul.f32 %v2758_v10, %v2758_v10  ;;  %v2760_v47 = vmul.f32 %v2654_v18, %v2539_v62  ;;  %v3473_v45 = vpop.f32.mrf.mxu1  ;;  %v4897_v29 = vsub.f32 %v4373_v56, %v4218_v39  ;;  %v2806_v48 = vsel %vm2776_vm5, %v2758_v10, 0.0 }
 0x1f3   : > { %v2804_v51 = vsel %vm2776_vm5, %v2757_v6, 0.0  ;;  %v2863_v16 = vmul.f32 %v2757_v6, %v2757_v6  ;;  %v2907_v19 = vadd.f32 %v2906_v60, %v2905_v63  ;;  %v2759_v59 = vmul.f32 %v2650_v36, %v2538_v22  ;;  %v4900_v60 = vld [vmem:[#allocation23_spill] sm:$0xff] }
 0x1f4   : > { %v2805_v52 = vadd.f32 %v2804_v51, %v2803_v4  ;;  %v2541_v55 = vadd.f32 %v3473_v45, %v4897_v29  ;;  %v2061_v24 = vpop.f32.mrf.mxu1  ;;  %v2666_v57 = vrot.slane %v4556_v0, %v4485_v23  ;;  %vm2570_vm7 = vcmp.lt.s32.totalorder %v2566_v46, 126 }
 0x1f5   : > { %v2908_v3 = vsel %vm2776_vm5, %v2863_v16, 0.0  ;;  %v2808_v18 = vsel %vm2776_vm5, %v2759_v59, 0.0  ;;  %v2865_v12 = vmul.f32 %v2759_v59, %v2759_v59  ;;  %v2910_v36 = vsel %vm2776_vm5, %v2864_v34, 0.0  ;;  %v4902_v16 = vld [vmem:[#allocation28_spill] sm:$0xff] }
 0x1f6   : > { %v2909_v21 = vadd.f32 %v2908_v3, %v2907_v19  ;;  %v2807_v50 = vadd.f32 %v2806_v48, %v2805_v52  ;;  %v2866_v49 = vmul.f32 %v2760_v47, %v2760_v47  ;;  %v2762_v28 = vmul.f32 %v2662_v40, %v2541_v55  ;;  %v3476_v53 = vpop.f32.mrf.mxu1 }
 0x1f7   : > { %v4898_v39 = vsub.f32 %v4356_v5, %v4214_v37  ;;  %v2912_v41 = vsel %vm2776_vm5, %v2865_v12, 0.0  ;;  %v2543_v8 = vadd.f32 %v3476_v53, %v4461_v11  ;;  %v2810_v35 = vsel %vm2776_vm5, %v2760_v47, 0.0  ;;  %v4903_v47 = vld [vmem:[#allocation22_spill] sm:$0xff] }
 0x1f8   : > { %v2809_v7 = vadd.f32 %v2808_v18, %v2807_v50  ;;  %v2911_v27 = vadd.f32 %v2910_v36, %v2909_v21  ;;  %v2071_v54 = vpop.f32.mrf.mxu1  ;;  %v2678_v61 = vrot.slane %v4556_v0, %v4491_v58  ;;  %v4644_v40 = vsel %vm2570_vm7, 1.0, %v4886_v9 }
 0x1f9   : > { %v2540_v56 = vadd.f32 %v4898_v39, %v2061_v24  ;;  %v2868_v5 = vmul.f32 %v2762_v28, %v2762_v28  ;;  %v2542_v10 = vadd.f32 %v4453_v32, %v2071_v54  ;;  %v2914_v42 = vsel %vm2776_vm5, %v2866_v49, 0.0  ;;  %v4905_v24 = vld [vmem:[#allocation36_spill] sm:$0xff] }
 0x1fa   : > { %v2913_v37 = vadd.f32 %v2912_v41, %v2911_v27  ;;  %v2811_v25 = vadd.f32 %v2810_v35, %v2809_v7  ;;  %v2764_v2 = vmul.f32 %v2670_v26, %v2543_v8  ;;  %v2674_v6 = vrot.slane %v4556_v0, %v4494_v15  ;;  %v4906_v41 = vld [vmem:[#allocation35_spill] sm:$0xff] }
 0x1fb   : > { %v2761_v30 = vmul.f32 %v2658_v44, %v2540_v56  ;;  %v3479_v44 = vpop.f32.mrf.mxu1  ;;  %v2686_v9 = vrot.slane %v4644_v40, %v4424_v14  ;;  %v2814_v46 = vsel %vm2776_vm5, %v2762_v28, 0.0  ;;  %v2763_v32 = vmul.f32 %v2666_v57, %v2542_v10 }
 0x1fc   : > { %v2915_v43 = vadd.f32 %v2914_v42, %v2913_v37  ;;  %v4901_v63 = vsub.f32 %v4899_v17, %v4900_v60  ;;  %v2918_v26 = vsel %vm2776_vm5, %v2868_v5, 0.0  ;;  %v4904_v0 = vsub.f32 %v4902_v16, %v4903_v47  ;;  %v4908_v37 = vld [vmem:[#allocation25_spill] sm:$0xff]  ;;  %v4913_v16 = vld [vmem:[#allocation38_spill] sm:$0xff] }
 0x1fd   : > { %v2812_v11 = vsel %vm2776_vm5, %v2761_v30, 0.0  ;;  %v2867_v31 = vmul.f32 %v2761_v30, %v2761_v30  ;;  %v2081_v22 = vpop.f32.mrf.mxu1  ;;  %v2870_v52 = vmul.f32 %v2764_v2, %v2764_v2  ;;  %v2816_v14 = vsel %vm2776_vm5, %v2763_v32, 0.0 }
 0x1fe   : > { %v2813_v33 = vadd.f32 %v2812_v11, %v2811_v25  ;;  %v2545_v4 = vadd.f32 %v3479_v44, %v4901_v63  ;;  %v2544_v45 = vadd.f32 %v4904_v0, %v2081_v22  ;;  %v2869_v19 = vmul.f32 %v2763_v32, %v2763_v32 }
 0x1ff   : > { %v2916_v62 = vsel %vm2776_vm5, %v2867_v31, 0.0  ;;  %v3482_v29 = vpop.f32.mrf.mxu1  ;;  %v2818_v21 = vsel %vm2776_vm5, %v2764_v2, 0.0  ;;  %v2682_v12 = vrot.slane %v4644_v40, %v3918_v20  ;;  %v2694_v36 = vrot.slane %v4644_v40, %v4458_v38  ;;  %v4907_v20 = vld [vmem:[#allocation30_spill] sm:$0xff] }
 0x200   : > { %v2917_v34 = vadd.f32 %v2916_v62, %v2915_v43  ;;  %v2815_v51 = vadd.f32 %v2814_v46, %v2813_v33  ;;  %v2766_v59 = vmul.f32 %v2678_v61, %v2545_v4  ;;  %v2765_v3 = vmul.f32 %v2674_v6, %v2544_v45  ;;  %v4910_v43 = vld [vmem:[#allocation29_spill] sm:$0xff]  ;;  %v4911_v6 = vld [vmem:[#allocation24_spill] sm:$0xff] }
 0x201   : > { %v2547_v57 = vadd.f32 %v3482_v29, %v4905_v24  ;;  %v2920_v50 = vsel %vm2776_vm5, %v2869_v19, 0.0  ;;  %v2091_v18 = vpop.f32.mrf.mxu1  ;;  %v2922_v53 = vsel %vm2776_vm5, %v2870_v52, 0.0  ;;  %v4909_v5 = vsub.f32 %v4907_v20, %v4908_v37  ;;  %v4914_v19 = vld [vmem:[#allocation37_spill] sm:$0xff] }
 0x202   : > { %v2817_v55 = vadd.f32 %v2816_v14, %v2815_v51  ;;  %v2919_v48 = vadd.f32 %v2918_v26, %v2917_v34  ;;  %v2820_v39 = vsel %vm2776_vm5, %v2765_v3, 0.0  ;;  %v2871_v56 = vmul.f32 %v2765_v3, %v2765_v3 }
 0x203   : > { %v2872_v7 = vmul.f32 %v2766_v59, %v2766_v59  ;;  %v2768_v27 = vmul.f32 %v2686_v9, %v2547_v57  ;;  %v2546_v8 = vadd.f32 %v4906_v41, %v2091_v18  ;;  %v3485_v35 = vpop.f32.mrf.mxu1  ;;  %v2822_v25 = vsel %vm2776_vm5, %v2766_v59, 0.0 }
 0x204   : > { %v2921_v49 = vadd.f32 %v2920_v50, %v2919_v48  ;;  %v2819_v28 = vadd.f32 %v2818_v21, %v2817_v55  ;;  %v2924_v61 = vsel %vm2776_vm5, %v2871_v56, 0.0  ;;  %v2549_v38 = vadd.f32 %v3485_v35, %v4909_v5  ;;  %v4915_v21 = vld [vmem:[#allocation34_spill] sm:$0xff]  ;;  %v4916_v50 = vld [vmem:[#allocation33_spill] sm:$0xff] }
 0x205   : > { %v2767_v10 = vmul.f32 %v2682_v12, %v2546_v8  ;;  %v2101_v42 = vpop.f32.mrf.mxu1  ;;  %v2690_v11 = vrot.slane %v4644_v40, %v4479_v13  ;;  %v2702_v31 = vrot.slane %v4644_v40, %v4482_v1  ;;  %v2874_v44 = vmul.f32 %v2768_v27, %v2768_v27 }
 0x206   : > { %v2821_v30 = vadd.f32 %v2820_v39, %v2819_v28  ;;  %v2923_v54 = vadd.f32 %v2922_v53, %v2921_v49  ;;  %v4912_v9 = vsub.f32 %v4910_v43, %v4911_v6  ;;  %v2926_v62 = vsel %vm2776_vm5, %v2872_v7, 0.0  ;;  %v4919_v49 = vld [vmem:[#allocation32_spill] sm:$0xff] }
 0x207   : > { %v2824_v32 = vsel %vm2776_vm5, %v2767_v10, 0.0  ;;  %v2873_v17 = vmul.f32 %v2767_v10, %v2767_v10  ;;  %v2770_v60 = vmul.f32 %v2694_v36, %v2549_v38  ;;  %v3488_v63 = vpop.f32.mrf.mxu1  ;;  %v2698_v13 = vrot.slane %v4644_v40, %v4485_v23  ;;  %v4918_v36 = vld [vmem:[#allocation27_spill] sm:$0xff] }
 0x208   : > { %v2925_v2 = vadd.f32 %v2924_v61, %v2923_v54  ;;  %v2823_v33 = vadd.f32 %v2822_v25, %v2821_v30  ;;  %v2548_v46 = vadd.f32 %v4912_v9, %v2101_v42  ;;  %v2710_v1 = vrot.slane %v4644_v40, %v4491_v58 }
 0x209   : > { %v2826_v26 = vsel %vm2776_vm5, %v2768_v27, 0.0  ;;  %v2928_v34 = vsel %vm2776_vm5, %v2873_v17, 0.0  ;;  %v2551_v47 = vadd.f32 %v3488_v63, %v4913_v16  ;;  %v2111_v0 = vpop.f32.mrf.mxu1  ;;  %v2930_v45 = vsel %vm2776_vm5, %v2874_v44, 0.0 }
 0x20a   : > { %v2825_v4 = vadd.f32 %v2824_v32, %v2823_v33  ;;  %v2927_v22 = vadd.f32 %v2926_v62, %v2925_v2  ;;  %v2769_v51 = vmul.f32 %v2690_v11, %v2548_v46  ;;  %v2550_v59 = vadd.f32 %v4914_v19, %v2111_v0  ;;  %v2848_v0 = vld [vmem:[%s3885_s23] sm:$0xff] }
 0x20b   : > { %v2876_v29 = vmul.f32 %v2770_v60, %v2770_v60  ;;  %v2772_v48 = vmul.f32 %v2702_v31, %v2551_v47  ;;  %v3491_v58 = vpop.f32.mrf.mxu1  ;;  %v4917_v18 = vsub.f32 %v4915_v21, %v4916_v50  ;;  %v2520_v28 = vsub.f32 %v4919_v49, %v4918_v36 }
 0x20c   : > { %v2929_v52 = vadd.f32 %v2928_v34, %v2927_v22  ;;  %v2827_v14 = vadd.f32 %v2826_v26, %v2825_v4  ;;  %v2828_v23 = vsel %vm2776_vm5, %v2769_v51, 0.0  ;;  %v2875_v55 = vmul.f32 %v2769_v51, %v2769_v51  ;;  %v2775_v51 = vld [vmem:[%s3883_s21] sm:$0xff] }
 0x20d   : > { %v2771_v57 = vmul.f32 %v2698_v13, %v2550_v59  ;;  %v2553_v12 = vadd.f32 %v3491_v58, %v4917_v18  ;;  %v2830_v39 = vsel %vm2776_vm5, %v2770_v60, 0.0  ;;  %v2121_v53 = vpop.f32.mrf.mxu1  ;;  %v2706_v7 = vrot.slane %v4644_v40, %v4494_v15 }
 0x20e   : > { %v2829_v3 = vadd.f32 %v2828_v23, %v2827_v14  ;;  %v2931_v24 = vadd.f32 %v2930_v45, %v2929_v52  ;;  %v2932_v56 = vsel %vm2776_vm5, %v2875_v55, 0.0  ;;  %v2934_v30 = vsel %vm2776_vm5, %v2876_v29, 0.0 }
 0x20f   : > { %v2832_v8 = vsel %vm2776_vm5, %v2771_v57, 0.0  ;;  %v2877_v35 = vmul.f32 %v2771_v57, %v2771_v57  ;;  %v2878_v54 = vmul.f32 %v2772_v48, %v2772_v48  ;;  %v2774_v61 = vmul.f32 %v2710_v1, %v2553_v12 }
 0x210   : > { %v2933_v27 = vadd.f32 %v2932_v56, %v2931_v24  ;;  %v2831_v41 = vadd.f32 %v2830_v39, %v2829_v3  ;;  %v2552_v20 = vadd.f32 %v2520_v28, %v2121_v53  ;;  %v2834_v25 = vsel %vm2776_vm5, %v2772_v48, 0.0 }
 0x211   : > { %v2936_v38 = vsel %vm2776_vm5, %v2877_v35, 0.0  ;;  %v2938_v15 = vsel %vm2776_vm5, %v2878_v54, 0.0  ;;  %v2880_v40 = vmul.f32 %v2774_v61, %v2774_v61  ;;  %v2838_v43 = vsel %vm2776_vm5, %v2774_v61, 0.0 }
 0x212   : > { %v2833_v37 = vadd.f32 %v2832_v8, %v2831_v41  ;;  %v2935_v5 = vadd.f32 %v2934_v30, %v2933_v27  ;;  %v2773_v10 = vmul.f32 %v2706_v7, %v2552_v20 }
 0x213   : > { %v2942_v62 = vsel %vm2776_vm5, %v2880_v40, 0.0 }
 0x214   : > { %v2937_v42 = vadd.f32 %v2936_v38, %v2935_v5  ;;  %v2835_v11 = vadd.f32 %v2834_v25, %v2833_v37  ;;  %v2836_v31 = vsel %vm2776_vm5, %v2773_v10, 0.0  ;;  %v2879_v2 = vmul.f32 %v2773_v10, %v2773_v10 }
 0x216   : > { %v2837_v44 = vadd.f32 %v2836_v31, %v2835_v11  ;;  %v2939_v33 = vadd.f32 %v2938_v15, %v2937_v42  ;;  %v2940_v6 = vsel %vm2776_vm5, %v2879_v2, 0.0 }
 0x218   : > { %v2839_v9 = vadd.f32 %v2838_v43, %v2837_v44  ;;  %v2941_v46 = vadd.f32 %v2940_v6, %v2939_v33 }
 0x21a   : > { %v2840_v32 = vrot.slane %v2839_v9, 4  ;;  %v2943_v17 = vadd.f32 %v2942_v62, %v2941_v46 }
 0x21c   : > { %v2841_v60 = vadd.f32 %v2840_v32, %v2839_v9  ;;  %v2944_v63 = vrot.slane %v2943_v17, 4 }
 0x21e   : > { %v2842_v4 = vrot.slane %v2841_v60, 2  ;;  %v2945_v22 = vadd.f32 %v2944_v63, %v2943_v17 }
 0x220   : > { %v2843_v13 = vadd.f32 %v2842_v4, %v2841_v60  ;;  %v2946_v1 = vrot.slane %v2945_v22, 2 }
 0x222   : > { %v2844_v26 = vrot.slane %v2843_v13, 1  ;;  %v2947_v34 = vadd.f32 %v2946_v1, %v2945_v22 }
 0x224   : > { %v2845_v16 = vadd.f32 %v2844_v26, %v2843_v13  ;;  %v2948_v47 = vrot.slane %v2947_v34, 1 }
 0x226   : > { %v2846_v45 = vadd.f32 %v2845_v16, %v2775_v51  ;;  %v2949_v52 = vadd.f32 %v2948_v47, %v2947_v34 }
 0x228   : > { %2847 = vst.msk [vmem:[%s3883_s21] sm:$0xff] %vm2776_vm5, %v2846_v45  ;;  %v2950_v14 = vadd.f32 %v2949_v52, %v2848_v0 }
 0x229   : > { %3610 = shalt.err (!%p3607_p8)
}
 0x22a   : > { %s3611_s21 = scalar_lea.hbm %s4723_s24, 128  ;;  %s3615_s17 = scalar_lea.hbm %s4924_s10, 256 }
 0x22b   : > { %p3612_p10 = scmp.ne.s32.totalorder %s4723_s24, %s3611_s21  ;;  %p3616_p13 = scmp.lt.s32.totalorder %s4723_s24, %s4924_s10 }
 0x22c   : > { %p3617_p0 = scmp.lt.s32.totalorder %s3615_s17, %s3611_s21 }
 0x22d   : > { %p3613_p11 = pnand %p3612_p10, %p3835_p3 }
 0x22e   : > { %p3618_p1 = por %p3617_p0, %p3616_p13 }
 0x22f   : > { %p3614_p12 = pneg %p3613_p11 }
 0x231   : > { %p3619_p2 = pnand %p3618_p1, %p3614_p12 }
 0x233   : > { %3622 = shalt.err (!%p3619_p2)
}
 0x234   : > { %3494 = dma.vmem_to_hbm [thread:$0]  (%p3835_p3), %s4725_s13, 128, %s4723_s24, %s2953_s19   ;;  %2951 = vst.msk [vmem:[%s3885_s23] sm:$0xff] %vm2776_vm5, %v2950_v14 }
 0x235   : > { %s2958_s28 = scalar_lea.sflag [#allocation5], %s4921_s25  ;;  %s3623_s30 = scalar_lea.vmem %s4734_s26, 128 }
 0x236   : > { %p3624_p4 = scmp.ne.s32.totalorder %s4734_s26, %s3623_s30  ;;  %s3725_s14 = smov [#allocation4]  }
 0x237   : > { %s3627_s15 = sshll.u32 %s3725_s14, 4  ;;  %s3628_s15 = int_to_ptr.vmem [resolvable:$false] %s3627_s15 }
 0x238   : > { %p3625_p5 = pnand %p3624_p4, %p3835_p3  ;;  %s3629_s22 = scalar_lea.vmem %s3628_s15, 256 }
 0x239   : > { %p3630_p7 = scmp.lt.s32.totalorder %s4734_s26, %s3628_s15  ;;  %p3631_p8 = scmp.lt.s32.totalorder %s3629_s22, %s3623_s30 }
 0x23a   : > { %p3626_p6 = pneg %p3625_p5 }
 0x23b   : > { %p3632_p10 = por %p3631_p8, %p3630_p7 }
 0x23d   : > { %p3633_p11 = pnand %p3632_p10, %p3626_p6 }
 0x23f   : > { %3636 = shalt.err (!%p3633_p11)
}
 0x240   : > { %s3637_s23 = scalar_lea.hbm %s4732_s29, 128  ;;  %s3641_s24 = scalar_lea.hbm %s4925_s11, 256 }
 0x241   : > { %p3638_p12 = scmp.ne.s32.totalorder %s4732_s29, %s3637_s23  ;;  %p3642_p1 = scmp.lt.s32.totalorder %s4732_s29, %s4925_s11 }
 0x242   : > { %p3643_p2 = scmp.lt.s32.totalorder %s3641_s24, %s3637_s23 }
 0x243   : > { %p3639_p13 = pnand %p3638_p12, %p3835_p3 }
 0x244   : > { %p3644_p4 = por %p3643_p2, %p3642_p1 }
 0x245   : > { %p3640_p0 = pneg %p3639_p13 }
 0x247   : > { %p3645_p5 = pnand %p3644_p4, %p3640_p0 }
 0x249   : > { %3648 = shalt.err (!%p3645_p5)
}
 0x24a   : > { %3495 = dma.vmem_to_hbm [thread:$0]  (%p3835_p3), %s4734_s26, 128, %s4732_s29, %s2958_s28  }
 0x24b PF: > { %s4926_s12 = sld [smem:[#allocation14_spill]] }
 0x24c   : > { %s4927_s27 = sld [smem:[#allocation8_spill]] }
 0x251   : > { %p3505_p6 = scmp.ge.s32.totalorder %s4926_s12, 2 }
 0x252   : > { %s2996_s18 = sand.u32 1, %s4927_s27  }
 0x253   : > { %p3499_p7 = pnand %p3505_p6, %p3845_p9  ;;  %s2997_s20 = scalar_lea.sflag [#allocation3], %s2996_s18 }
 0x255   : > { %p3500_p8 = pneg %p3499_p7 }
 0x257   : > { %3682 = dma.done.wait (%p3500_p8), %s2997_s20, 128  }
 0x258   : > { %3684 = vsyncadd (%p3500_p8), %s2997_s20, 4294967168  ;;  %s3006_s30 = scalar_lea.sflag [#allocation5], %s2996_s18 }
 0x259   : > { %3686 = dma.done.wait (%p3500_p8), %s3006_s30, 128  }
 0x25a   : > { %3688 = vsyncadd (%p3500_p8), %s3006_s30, 4294967168  ;;  %s28_s24 = sadd.s32 1, %s4926_s12   ;;  %s4929_s17 = sld [smem:[#allocation9_spill]] }
 0x25b   : > { %p25_p10 = scmp.ge.s32.totalorder %s28_s24, 6   ;;  %s4930_s18 = sld [smem:[#allocation10_spill]] }
 0x25c   : > { %s4931_s19 = sld [smem:[#allocation19_spill]] }
 0x25d   : > { %s4932_s20 = sld [smem:[#allocation12_spill]]  ;;  %27 = sbr.rel (!%p25_p10) target bundleno = 10 (0xa), region = 125 }
 0x25e   : > { %s4933_s21 = sld [smem:[#allocation13_spill]] }
 0x25f   : > { %s4934_s22 = sld [smem:[#allocation15_spill]] }
 0x260   : > { %s4935_s23 = sld [smem:[#allocation17_spill]] }
 0x262   :  { %3011 = vsyncpa [#allocation3], 1 }
 0x263   :  { %3013 = vsyncpa [#allocation3 + $0x1], 1 }
 0x264   :  { %3014 = vsyncpa [#allocation5], 1 }
 0x265   :  { %3016 = vsyncpa [#allocation5 + $0x1], 1 }

</bundles_post_ra>
